<compile_context>
chip_gen: v5e
topology: v5e:2x2
jax: 0.10.0
libtpu: 0.0.40
codegen_flags: <defaults>
</compile_context>

<pallas_src>
import jax
import jax.numpy as jnp
from jax.experimental import pallas as pl
from jax.experimental.pallas import tpu as pltpu

# ----------------------------- model configuration -----------------------------
B = 2             # batch
C = 3             # image channels
IMG = 32          # image height/width
P = 16            # patch size (ViT patch16)
GRID = IMG // P   # 2
NUM_PATCH = GRID * GRID        # 4
S = NUM_PATCH + 1              # 5 tokens (CLS + patches)
S_PAD = 8                      # tokens padded to a sublane multiple
D = 32            # hidden size
H = 4             # attention heads
DH = D // H       # 8 head dim
D3 = 3 * D        # 96 fused QKV width
MLP = 64          # intermediate size
LAYERS = 2        # transformer layers
NUM_CLASSES = 10
CLS_PAD = 128     # lane-dense classifier width (sliced to 10 outside)
CPP = C * P * P   # 768 flattened patch length
EPS = 1e-12       # HF ViT layer_norm_eps
SCALE = 1.0 / float(DH) ** 0.5
INV_SQRT2 = 0.7071067811865476
NEG = -1e30

# --------------------- packed bf16 weight-slab row layout ----------------------
# One (W_ROWS, 128) bf16 slab holds every matmul weight (static row offsets).
W_PATCH = 0                               # rows [0,768)  cols [0:32)   patch embed
LAYER_W_ROWS = D + D + MLP                # 32 (wqkv|wo) + 32 (w1) + 64 (w2) = 128
W_LAYER0 = CPP


def _w_layer_base(layer):
    return W_LAYER0 + layer * LAYER_W_ROWS


W_CLS = W_LAYER0 + LAYERS * LAYER_W_ROWS  # classifier weight rows
W_ROWS = W_CLS + D                        # 1056


# ----------------------- packed f32 small-params layout -------------------------
def _f_layout(imgs_per_block):
    """Row offsets inside the (F_ROWS, 128) f32 slab."""
    R = imgs_per_block * S_PAD
    row_init = 0          # rows [0,R): cols[0:D] per-token init bias, cols[64:64+R] attn bias
    row_glob = R          # lnf_g[0:32] | lnf_b[32:64]
    row_clsb = R + 1      # classifier bias (128-wide)
    row_l0 = R + 2        # 3 rows per layer:
                          #   +0: ln1_g|ln1_b|ln2_g|ln2_b   +1: bqkv|bo   +2: b1|b2
    f_rows = row_l0 + 3 * LAYERS
    f_rows = ((f_rows + 7) // 8) * 8
    return R, row_init, row_glob, row_clsb, row_l0, f_rows


# --------------------------------- kernel math ----------------------------------
def _ln(x, g, b):
    # f32 LayerNorm statistics (v5e has no bf16 VPU path).
    mu = jnp.mean(x, axis=-1, keepdims=True)
    xc = x - mu
    var = jnp.mean(xc * xc, axis=-1, keepdims=True)
    return xc * jax.lax.rsqrt(var + EPS) * g + b


def _erf(x):
    # Abramowitz & Stegun 7.1.26 polynomial (|err| < 1.5e-7): only abs/div/exp/where,
    # all of which Mosaic lowers (no reliance on a lax.erf rule).
    a = jnp.abs(x)
    t = 1.0 / (1.0 + 0.3275911 * a)
    poly = ((((1.061405429 * t - 1.453152027) * t + 1.421413741) * t
             - 0.284496736) * t + 0.254829592) * t
    e = 1.0 - poly * jnp.exp(-a * a)
    return jnp.where(x < 0.0, -e, e)


def _bf(x):
    return x.astype(jnp.bfloat16)


def make_vit_kernel(imgs_per_block):
    R, row_init, row_glob, row_clsb, row_l0, _ = _f_layout(imgs_per_block)

    def kernel(patches_ref, w_ref, f_ref, out_ref):
        # ---- patch embedding: one matmul + one fused per-token bias add ----------
        # patches_ref already carries the [CLS | patches | pad] token row layout
        # (CLS / pad rows zeroed on host), so
        #   h = patches @ W_patch + (cls_tok+pos[0] | patch_b+pos[i] | 0)
        h = jnp.dot(patches_ref[...], w_ref[W_PATCH:W_PATCH + CPP, 0:D],
                    preferred_element_type=jnp.float32)
        h = h + f_ref[row_init:row_init + R, 0:D]                     # (R, D)

        # additive attention mask: 0 on same-image valid keys, -1e30 elsewhere
        attn_bias = f_ref[row_init:row_init + R, 64:64 + R]           # (R, R)

        for layer in range(LAYERS):
            wb = _w_layer_base(layer)
            fb = row_l0 + 3 * layer
            ln1_g = f_ref[fb:fb + 1, 0:D]
            ln1_b = f_ref[fb:fb + 1, D:2 * D]
            ln2_g = f_ref[fb:fb + 1, 2 * D:3 * D]
            ln2_b = f_ref[fb:fb + 1, 3 * D:4 * D]

            # ------------------ pre-LN multi-head self-attention ------------------
            hn = _ln(h, ln1_g, ln1_b)
            qkv = jnp.dot(_bf(hn), w_ref[wb:wb + D, 0:D3],
                          preferred_element_type=jnp.float32)
            qkv = qkv + f_ref[fb + 1:fb + 2, 0:D3]                    # (R, 3D)

            ctx_cols = []
            for hd in range(H):
                q = _bf(qkv[:, hd * DH:(hd + 1) * DH])                # (R, DH); scale pre-folded
                k = _bf(qkv[:, D + hd * DH:D + (hd + 1) * DH])
                v = _bf(qkv[:, 2 * D + hd * DH:2 * D + (hd + 1) * DH])
                s = jax.lax.dot_general(q, k, (((1,), (1,)), ((), ())),
                                        preferred_element_type=jnp.float32)
                s = s + attn_bias                                     # (R, R)
                s = s - jnp.max(s, axis=-1, keepdims=True)
                prob = jnp.exp(s)
                prob = prob * pl.reciprocal(
                    jnp.sum(prob, axis=-1, keepdims=True), approx=True)
                ctx_cols.append(jnp.dot(_bf(prob), v,
                                        preferred_element_type=jnp.float32))
            ctx = jnp.concatenate(ctx_cols, axis=1)                   # (R, D)

            attn_out = jnp.dot(_bf(ctx), w_ref[wb:wb + D, D3:D3 + D],
                               preferred_element_type=jnp.float32)
            h = h + attn_out + f_ref[fb + 1:fb + 2, D3:D3 + D]        # residual

            # --------------------- pre-LN MLP with exact GELU ---------------------
            hn = _ln(h, ln2_g, ln2_b)
            m = jnp.dot(_bf(hn), w_ref[wb + D:wb + 2 * D, 0:MLP],
                        preferred_element_type=jnp.float32)
            m = m + f_ref[fb + 2:fb + 3, 0:MLP]
            m = 0.5 * m * (1.0 + _erf(m * INV_SQRT2))                 # HF 'gelu'
            mlp_out = jnp.dot(_bf(m), w_ref[wb + 2 * D:wb + 2 * D + MLP, 0:D],
                              preferred_element_type=jnp.float32)
            h = h + mlp_out + f_ref[fb + 2:fb + 3, MLP:MLP + D]       # residual

        # ------------- final LayerNorm + lane-dense classifier head -------------
        hn = _ln(h, f_ref[row_glob:row_glob + 1, 0:D],
                 f_ref[row_glob:row_glob + 1, D:2 * D])
        out_ref[...] = (jnp.dot(_bf(hn), w_ref[W_CLS:W_CLS + D, 0:CLS_PAD],
                                preferred_element_type=jnp.float32)
                        + f_ref[row_clsb:row_clsb + 1, 0:CLS_PAD])

    return kernel


# ------------------------------- parameter init ---------------------------------
def init_params(key):
    ks = iter(jax.random.split(key, 64))

    def nrm(shape, std=0.02):
        return std * jax.random.normal(next(ks), shape, dtype=jnp.float32)

    params = {
        "patch_w": nrm((CPP, D)),
        "patch_b": jnp.zeros((D,), jnp.float32),
        "cls": nrm((1, D)),
        "pos": nrm((S, D)),
        "lnf_g": jnp.ones((D,), jnp.float32),
        "lnf_b": jnp.zeros((D,), jnp.float32),
        "cls_w": nrm((D, NUM_CLASSES)),
        "cls_b": jnp.zeros((NUM_CLASSES,), jnp.float32),
        "layers": [],
    }
    for _ in range(LAYERS):
        params["layers"].append({
            "ln1_g": jnp.ones((D,), jnp.float32),
            "ln1_b": jnp.zeros((D,), jnp.float32),
            "wq": nrm((D, D)), "bq": jnp.zeros((D,), jnp.float32),
            "wk": nrm((D, D)), "bk": jnp.zeros((D,), jnp.float32),
            "wv": nrm((D, D)), "bv": jnp.zeros((D,), jnp.float32),
            "wo": nrm((D, D)), "bo": jnp.zeros((D,), jnp.float32),
            "ln2_g": jnp.ones((D,), jnp.float32),
            "ln2_b": jnp.zeros((D,), jnp.float32),
            "w1": nrm((D, MLP)), "b1": jnp.zeros((MLP,), jnp.float32),
            "w2": nrm((MLP, D)), "b2": jnp.zeros((D,), jnp.float32),
        })
    return params


def pack_params(p, imgs_per_block):
    """Repack all parameters into two slabs (two input DMAs total):
       w_slab (W_ROWS,128) bf16 : every matmul weight, 1/sqrt(dh) folded into wq/bq.
       f_slab (F_ROWS,128) f32  : biases / LN params / CLS+positional init rows /
                                  additive block-diagonal attention mask."""
    R, row_init, row_glob, row_clsb, row_l0, f_rows = _f_layout(imgs_per_block)
    assert R <= 64, "attention-bias lanes [64:64+R] must fit the 128-wide slab"

    # ---------------- bf16 weight slab ----------------
    w = jnp.zeros((W_ROWS, 128), jnp.float32)
    w = w.at[W_PATCH:W_PATCH + CPP, 0:D].set(p["patch_w"])
    for layer, lp in enumerate(p["layers"]):
        wb = _w_layer_base(layer)
        wqkv = jnp.concatenate([lp["wq"] * SCALE, lp["wk"], lp["wv"]], axis=1)
        w = w.at[wb:wb + D, 0:D3].set(wqkv)
        w = w.at[wb:wb + D, D3:D3 + D].set(lp["wo"])
        w = w.at[wb + D:wb + 2 * D, 0:MLP].set(lp["w1"])
        w = w.at[wb + 2 * D:wb + 2 * D + MLP, 0:D].set(lp["w2"])
    w = w.at[W_CLS:W_CLS + D, 0:NUM_CLASSES].set(p["cls_w"])
    w_slab = w.astype(jnp.bfloat16)

    # ---------------- f32 small-params slab ----------------
    f = jnp.zeros((f_rows, 128), jnp.float32)
    # per-token init bias: CLS row = cls_tok + pos[0]; patch rows = patch_b + pos[i];
    # padded token rows stay 0 (their patch rows are zero too).
    init = jnp.zeros((S_PAD, D), jnp.float32)
    init = init.at[0].set(p["cls"][0] + p["pos"][0])
    init = init.at[1:S].set(p["patch_b"][None, :] + p["pos"][1:S])
    f = f.at[row_init:row_init + R, 0:D].set(jnp.tile(init, (imgs_per_block, 1)))
    # additive attention mask: same-image blocks only, padded key columns masked
    r = jnp.arange(R)
    same_img = (r[:, None] // S_PAD) == (r[None, :] // S_PAD)
    key_ok = (r[None, :] % S_PAD) < S
    f = f.at[row_init:row_init + R, 64:64 + R].set(
        jnp.where(same_img & key_ok, 0.0, NEG))
    # globals
    f = f.at[row_glob, 0:D].set(p["lnf_g"])
    f = f.at[row_glob, D:2 * D].set(p["lnf_b"])
    f = f.at[row_clsb, 0:NUM_CLASSES].set(p["cls_b"])
    # per layer
    for layer, lp in enumerate(p["layers"]):
        fb = row_l0 + 3 * layer
        f = f.at[fb, 0:D].set(lp["ln1_g"])
        f = f.at[fb, D:2 * D].set(lp["ln1_b"])
        f = f.at[fb, 2 * D:3 * D].set(lp["ln2_g"])
        f = f.at[fb, 3 * D:4 * D].set(lp["ln2_b"])
        f = f.at[fb + 1, 0:D].set(lp["bq"] * SCALE)
        f = f.at[fb + 1, D:2 * D].set(lp["bk"])
        f = f.at[fb + 1, 2 * D:3 * D].set(lp["bv"])
        f = f.at[fb + 1, D3:D3 + D].set(lp["bo"])
        f = f.at[fb + 2, 0:MLP].set(lp["b1"])
        f = f.at[fb + 2, MLP:MLP + D].set(lp["b2"])
    return w_slab, f


# ------------------------------- grid-shape choice ------------------------------
def choose_imgs_per_block(batch):
    """v5e/v6e (1 TensorCore): fold the whole batch into one grid step (grid=(1,)).
       v7x / v4 / v5p (2 TCs per device): keep a 2-way 'parallel' grid axis."""
    try:
        kind = jax.devices()[0].device_kind.lower()
    except Exception:
        kind = ""
    two_core = any(tag in kind for tag in ("v7", "v4", "v5p"))
    ipb = batch // 2 if (two_core and batch % 2 == 0) else batch
    ipb = max(1, min(ipb, 8))          # keep R = 8*ipb <= 64 for the mask lane packing
    while batch % ipb:
        ipb -= 1
    return ipb


# ----------------------------------- forward ------------------------------------
def vit_forward(x, w_slab, f_slab, imgs_per_block):
    """x: (B, C, IMG, IMG) NCHW float32 -> logits (B, NUM_CLASSES)."""
    b = x.shape[0]
    assert b % imgs_per_block == 0
    blocks = b // imgs_per_block
    R = imgs_per_block * S_PAD
    f_rows = f_slab.shape[0]

    # im2col for Conv2d(k=P, s=P) (pure layout), then place patch rows into the
    # per-image token layout [CLS | patches | pad] so the kernel's first matmul
    # directly yields token rows. Cast to bf16 for the MXU.
    patches = (x.reshape(b, C, GRID, P, GRID, P)
                 .transpose(0, 2, 4, 1, 3, 5)                 # (B, gh, gw, C, P, P)
                 .reshape(b, NUM_PATCH, CPP))
    tok = jnp.zeros((b, S_PAD, CPP), jnp.float32).at[:, 1:S, :].set(patches)
    tok = tok.reshape(b * S_PAD, CPP).astype(jnp.bfloat16)

    out = pl.pallas_call(
        make_vit_kernel(imgs_per_block),
        out_shape=jax.ShapeDtypeStruct((b * S_PAD, CLS_PAD), jnp.float32),
        grid_spec=pltpu.PrefetchScalarGridSpec(
            num_scalar_prefetch=0,
            grid=(blocks,),
            in_specs=[
                pl.BlockSpec((R, CPP), lambda i: (i, 0)),       # tokenized patches
                pl.BlockSpec((W_ROWS, 128), lambda i: (0, 0)),  # bf16 weight slab
                pl.BlockSpec((f_rows, 128), lambda i: (0, 0)),  # f32 small params
            ],
            out_specs=pl.BlockSpec((R, CLS_PAD), lambda i: (i, 0)),
        ),
        compiler_params=pltpu.CompilerParams(
            dimension_semantics=("parallel",)),   # 2-way across TCs on v7x/megacore
    )(tok, w_slab, f_slab)

    # row (img*S_PAD) of the output is that image's CLS token; the first
    # NUM_CLASSES lanes are the real logits (padded to 128 for a lane-dense store).
    return out.reshape(b, S_PAD, CLS_PAD)[:, 0, :NUM_CLASSES]


# ------------------------------------- main --------------------------------------
if __name__ == "__main__":
    key = jax.random.PRNGKey(0)
    k_param, k_x = jax.random.split(key)
    params = init_params(k_param)

    imgs_per_block = choose_imgs_per_block(B)
    w_slab, f_slab = pack_params(params, imgs_per_block)
    x = jax.random.normal(k_x, (B, C, IMG, IMG), dtype=jnp.float32)

    fwd = jax.jit(vit_forward, static_argnums=(3,))
    logits = jax.block_until_ready(fwd(x, w_slab, f_slab, imgs_per_block))

    assert logits.shape == (B, NUM_CLASSES)
    assert bool(jnp.all(jnp.isfinite(logits)))
    print("KERNEL_OK")
</pallas_src>

<mosaic_0001>
module attributes {stable_mosaic.version = 11 : i64} {
  func.func @kernel(%arg0: i32, %arg1: memref<16x768xbf16, #tpu.memory_space<vmem>>, %arg2: memref<1056x128xbf16, #tpu.memory_space<vmem>>, %arg3: memref<24x128xf32, #tpu.memory_space<vmem>>, %arg4: memref<16x128xf32, #tpu.memory_space<vmem>>) attributes {dimension_semantics = [#tpu.dimension_semantics<parallel>], iteration_bounds = array<i64: 1>, scalar_prefetch = 0 : i64, scratch_operands = 0 : i64, tpu.core_type = #tpu.core_type<tc>, window_params = [{transform_indices = @transform_0, window_bounds = array<i64: 16, 768>}, {pipeline_mode = #tpu.pipeline_mode<synchronous>, transform_indices = @transform_1, window_bounds = array<i64: 1056, 128>}, {pipeline_mode = #tpu.pipeline_mode<synchronous>, transform_indices = @transform_2, window_bounds = array<i64: 24, 128>}, {transform_indices = @transform_3, window_bounds = array<i64: 16, 128>}]} {
    %c0 = arith.constant 0 : index
    %c0_0 = arith.constant 0 : index
    %0 = vector.load %arg1[%c0, %c0_0] : memref<16x768xbf16, #tpu.memory_space<vmem>>, vector<16x768xbf16>
    %c0_1 = arith.constant 0 : index
    %c0_2 = arith.constant 0 : index
    %1 = vector.load %arg2[%c0_1, %c0_2] : memref<1056x128xbf16, #tpu.memory_space<vmem>>, vector<768x32xbf16>
    %cst = arith.constant dense<0.000000e+00> : vector<16x32xf32>
    %2 = tpu.matmul %0, %1, %cst {dimension_numbers = #tpu.dot_dimension_numbers<[1], [0], [0], [1], [0, 0, 1, 1], [], []>} : vector<16x768xbf16>, vector<768x32xbf16>, vector<16x32xf32> -> vector<16x32xf32>
    %c0_3 = arith.constant 0 : index
    %c0_4 = arith.constant 0 : index
    %3 = vector.load %arg3[%c0_3, %c0_4] : memref<24x128xf32, #tpu.memory_space<vmem>>, vector<16x32xf32>
    %4 = arith.addf %2, %3 : vector<16x32xf32>
    %c0_5 = arith.constant 0 : index
    %c64 = arith.constant 64 : index
    %5 = vector.load %arg3[%c0_5, %c64] : memref<24x128xf32, #tpu.memory_space<vmem>>, vector<16x16xf32>
    %c18 = arith.constant 18 : index
    %c0_6 = arith.constant 0 : index
    %6 = vector.load %arg3[%c18, %c0_6] : memref<24x128xf32, #tpu.memory_space<vmem>>, vector<1x32xf32>
    %c18_7 = arith.constant 18 : index
    %c32 = arith.constant 32 : index
    %7 = vector.load %arg3[%c18_7, %c32] : memref<24x128xf32, #tpu.memory_space<vmem>>, vector<1x32xf32>
    %c18_8 = arith.constant 18 : index
    %c64_9 = arith.constant 64 : index
    %8 = vector.load %arg3[%c18_8, %c64_9] : memref<24x128xf32, #tpu.memory_space<vmem>>, vector<1x32xf32>
    %c18_10 = arith.constant 18 : index
    %c96 = arith.constant 96 : index
    %9 = vector.load %arg3[%c18_10, %c96] : memref<24x128xf32, #tpu.memory_space<vmem>>, vector<1x32xf32>
    %cst_11 = arith.constant dense<0.000000e+00> : vector<16xf32>
    %10 = vector.multi_reduction <add>, %4, %cst_11 [1] : vector<16x32xf32> to vector<16xf32>
    %11 = vector.shape_cast %10 : vector<16xf32> to vector<16x1xf32>
    %cst_12 = arith.constant 3.200000e+01 : f32
    %12 = vector.broadcast %cst_12 : f32 to vector<16x1xf32>
    %13 = arith.divf %11, %12 : vector<16x1xf32>
    %14 = vector.broadcast %13 : vector<16x1xf32> to vector<16x32xf32>
    %15 = arith.subf %4, %14 : vector<16x32xf32>
    %16 = arith.mulf %15, %15 : vector<16x32xf32>
    %cst_13 = arith.constant dense<0.000000e+00> : vector<16xf32>
    %17 = vector.multi_reduction <add>, %16, %cst_13 [1] : vector<16x32xf32> to vector<16xf32>
    %18 = vector.shape_cast %17 : vector<16xf32> to vector<16x1xf32>
    %cst_14 = arith.constant 3.200000e+01 : f32
    %19 = vector.broadcast %cst_14 : f32 to vector<16x1xf32>
    %20 = arith.divf %18, %19 : vector<16x1xf32>
    %cst_15 = arith.constant 9.99999996E-13 : f32
    %21 = vector.broadcast %cst_15 : f32 to vector<16x1xf32>
    %22 = arith.addf %20, %21 : vector<16x1xf32>
    %23 = math.rsqrt %22 : vector<16x1xf32>
    %24 = vector.broadcast %23 : vector<16x1xf32> to vector<16x32xf32>
    %25 = arith.mulf %15, %24 : vector<16x32xf32>
    %26 = vector.broadcast %6 : vector<1x32xf32> to vector<16x32xf32>
    %27 = arith.mulf %25, %26 : vector<16x32xf32>
    %28 = vector.broadcast %7 : vector<1x32xf32> to vector<16x32xf32>
    %29 = arith.addf %27, %28 : vector<16x32xf32>
    %30 = arith.truncf %29 : vector<16x32xf32> to vector<16x32xbf16>
    %c768 = arith.constant 768 : index
    %c0_16 = arith.constant 0 : index
    %31 = vector.load %arg2[%c768, %c0_16] : memref<1056x128xbf16, #tpu.memory_space<vmem>>, vector<32x96xbf16>
    %cst_17 = arith.constant dense<0.000000e+00> : vector<16x96xf32>
    %32 = tpu.matmul %30, %31, %cst_17 {dimension_numbers = #tpu.dot_dimension_numbers<[1], [0], [0], [1], [0, 0, 1, 1], [], []>} : vector<16x32xbf16>, vector<32x96xbf16>, vector<16x96xf32> -> vector<16x96xf32>
    %c19 = arith.constant 19 : index
    %c0_18 = arith.constant 0 : index
    %33 = vector.load %arg3[%c19, %c0_18] : memref<24x128xf32, #tpu.memory_space<vmem>>, vector<1x96xf32>
    %34 = vector.broadcast %33 : vector<1x96xf32> to vector<16x96xf32>
    %35 = arith.addf %32, %34 : vector<16x96xf32>
    %36 = vector.extract_strided_slice %35 {offsets = [0, 0], sizes = [16, 8], strides = [1, 1]} : vector<16x96xf32> to vector<16x8xf32>
    %37 = arith.truncf %36 : vector<16x8xf32> to vector<16x8xbf16>
    %38 = vector.extract_strided_slice %35 {offsets = [0, 32], sizes = [16, 8], strides = [1, 1]} : vector<16x96xf32> to vector<16x8xf32>
    %39 = arith.truncf %38 : vector<16x8xf32> to vector<16x8xbf16>
    %40 = vector.extract_strided_slice %35 {offsets = [0, 64], sizes = [16, 8], strides = [1, 1]} : vector<16x96xf32> to vector<16x8xf32>
    %41 = arith.truncf %40 : vector<16x8xf32> to vector<16x8xbf16>
    %cst_19 = arith.constant dense<0.000000e+00> : vector<16x16xf32>
    %42 = tpu.matmul %37, %39, %cst_19 {dimension_numbers = #tpu.dot_dimension_numbers<[1], [1], [0], [0], [0, 0, 1, 0], [], []>} : vector<16x8xbf16>, vector<16x8xbf16>, vector<16x16xf32> -> vector<16x16xf32>
    %43 = arith.addf %42, %5 : vector<16x16xf32>
    %cst_20 = arith.constant dense<0xFF800000> : vector<16xf32>
    %44 = vector.multi_reduction <maximumf>, %43, %cst_20 [1] : vector<16x16xf32> to vector<16xf32>
    %45 = vector.shape_cast %44 : vector<16xf32> to vector<16x1xf32>
    %46 = vector.broadcast %45 : vector<16x1xf32> to vector<16x16xf32>
    %47 = arith.subf %43, %46 : vector<16x16xf32>
    %48 = math.exp %47 : vector<16x16xf32>
    %cst_21 = arith.constant dense<0.000000e+00> : vector<16xf32>
    %49 = vector.multi_reduction <add>, %48, %cst_21 [1] : vector<16x16xf32> to vector<16xf32>
    %50 = vector.shape_cast %49 : vector<16xf32> to vector<16x1xf32>
    %51 = tpu.reciprocal %50 {approx = true} : vector<16x1xf32> -> vector<16x1xf32>
    %52 = vector.broadcast %51 : vector<16x1xf32> to vector<16x16xf32>
    %53 = arith.mulf %48, %52 : vector<16x16xf32>
    %54 = arith.truncf %53 : vector<16x16xf32> to vector<16x16xbf16>
    %cst_22 = arith.constant dense<0.000000e+00> : vector<16x8xf32>
    %55 = tpu.matmul %54, %41, %cst_22 {dimension_numbers = #tpu.dot_dimension_numbers<[1], [0], [0], [1], [0, 0, 1, 1], [], []>} : vector<16x16xbf16>, vector<16x8xbf16>, vector<16x8xf32> -> vector<16x8xf32>
    %56 = vector.extract_strided_slice %35 {offsets = [0, 8], sizes = [16, 8], strides = [1, 1]} : vector<16x96xf32> to vector<16x8xf32>
    %57 = arith.truncf %56 : vector<16x8xf32> to vector<16x8xbf16>
    %58 = vector.extract_strided_slice %35 {offsets = [0, 40], sizes = [16, 8], strides = [1, 1]} : vector<16x96xf32> to vector<16x8xf32>
    %59 = arith.truncf %58 : vector<16x8xf32> to vector<16x8xbf16>
    %60 = vector.extract_strided_slice %35 {offsets = [0, 72], sizes = [16, 8], strides = [1, 1]} : vector<16x96xf32> to vector<16x8xf32>
    %61 = arith.truncf %60 : vector<16x8xf32> to vector<16x8xbf16>
    %cst_23 = arith.constant dense<0.000000e+00> : vector<16x16xf32>
    %62 = tpu.matmul %57, %59, %cst_23 {dimension_numbers = #tpu.dot_dimension_numbers<[1], [1], [0], [0], [0, 0, 1, 0], [], []>} : vector<16x8xbf16>, vector<16x8xbf16>, vector<16x16xf32> -> vector<16x16xf32>
    %63 = arith.addf %62, %5 : vector<16x16xf32>
    %cst_24 = arith.constant dense<0xFF800000> : vector<16xf32>
    %64 = vector.multi_reduction <maximumf>, %63, %cst_24 [1] : vector<16x16xf32> to vector<16xf32>
    %65 = vector.shape_cast %64 : vector<16xf32> to vector<16x1xf32>
    %66 = vector.broadcast %65 : vector<16x1xf32> to vector<16x16xf32>
    %67 = arith.subf %63, %66 : vector<16x16xf32>
    %68 = math.exp %67 : vector<16x16xf32>
    %cst_25 = arith.constant dense<0.000000e+00> : vector<16xf32>
    %69 = vector.multi_reduction <add>, %68, %cst_25 [1] : vector<16x16xf32> to vector<16xf32>
    %70 = vector.shape_cast %69 : vector<16xf32> to vector<16x1xf32>
    %71 = tpu.reciprocal %70 {approx = true} : vector<16x1xf32> -> vector<16x1xf32>
    %72 = vector.broadcast %71 : vector<16x1xf32> to vector<16x16xf32>
    %73 = arith.mulf %68, %72 : vector<16x16xf32>
    %74 = arith.truncf %73 : vector<16x16xf32> to vector<16x16xbf16>
    %cst_26 = arith.constant dense<0.000000e+00> : vector<16x8xf32>
    %75 = tpu.matmul %74, %61, %cst_26 {dimension_numbers = #tpu.dot_dimension_numbers<[1], [0], [0], [1], [0, 0, 1, 1], [], []>} : vector<16x16xbf16>, vector<16x8xbf16>, vector<16x8xf32> -> vector<16x8xf32>
    %76 = vector.extract_strided_slice %35 {offsets = [0, 16], sizes = [16, 8], strides = [1, 1]} : vector<16x96xf32> to vector<16x8xf32>
    %77 = arith.truncf %76 : vector<16x8xf32> to vector<16x8xbf16>
    %78 = vector.extract_strided_slice %35 {offsets = [0, 48], sizes = [16, 8], strides = [1, 1]} : vector<16x96xf32> to vector<16x8xf32>
    %79 = arith.truncf %78 : vector<16x8xf32> to vector<16x8xbf16>
    %80 = vector.extract_strided_slice %35 {offsets = [0, 80], sizes = [16, 8], strides = [1, 1]} : vector<16x96xf32> to vector<16x8xf32>
    %81 = arith.truncf %80 : vector<16x8xf32> to vector<16x8xbf16>
    %cst_27 = arith.constant dense<0.000000e+00> : vector<16x16xf32>
    %82 = tpu.matmul %77, %79, %cst_27 {dimension_numbers = #tpu.dot_dimension_numbers<[1], [1], [0], [0], [0, 0, 1, 0], [], []>} : vector<16x8xbf16>, vector<16x8xbf16>, vector<16x16xf32> -> vector<16x16xf32>
    %83 = arith.addf %82, %5 : vector<16x16xf32>
    %cst_28 = arith.constant dense<0xFF800000> : vector<16xf32>
    %84 = vector.multi_reduction <maximumf>, %83, %cst_28 [1] : vector<16x16xf32> to vector<16xf32>
    %85 = vector.shape_cast %84 : vector<16xf32> to vector<16x1xf32>
    %86 = vector.broadcast %85 : vector<16x1xf32> to vector<16x16xf32>
    %87 = arith.subf %83, %86 : vector<16x16xf32>
    %88 = math.exp %87 : vector<16x16xf32>
    %cst_29 = arith.constant dense<0.000000e+00> : vector<16xf32>
    %89 = vector.multi_reduction <add>, %88, %cst_29 [1] : vector<16x16xf32> to vector<16xf32>
    %90 = vector.shape_cast %89 : vector<16xf32> to vector<16x1xf32>
    %91 = tpu.reciprocal %90 {approx = true} : vector<16x1xf32> -> vector<16x1xf32>
    %92 = vector.broadcast %91 : vector<16x1xf32> to vector<16x16xf32>
    %93 = arith.mulf %88, %92 : vector<16x16xf32>
    %94 = arith.truncf %93 : vector<16x16xf32> to vector<16x16xbf16>
    %cst_30 = arith.constant dense<0.000000e+00> : vector<16x8xf32>
    %95 = tpu.matmul %94, %81, %cst_30 {dimension_numbers = #tpu.dot_dimension_numbers<[1], [0], [0], [1], [0, 0, 1, 1], [], []>} : vector<16x16xbf16>, vector<16x8xbf16>, vector<16x8xf32> -> vector<16x8xf32>
    %96 = vector.extract_strided_slice %35 {offsets = [0, 24], sizes = [16, 8], strides = [1, 1]} : vector<16x96xf32> to vector<16x8xf32>
    %97 = arith.truncf %96 : vector<16x8xf32> to vector<16x8xbf16>
    %98 = vector.extract_strided_slice %35 {offsets = [0, 56], sizes = [16, 8], strides = [1, 1]} : vector<16x96xf32> to vector<16x8xf32>
    %99 = arith.truncf %98 : vector<16x8xf32> to vector<16x8xbf16>
    %100 = vector.extract_strided_slice %35 {offsets = [0, 88], sizes = [16, 8], strides = [1, 1]} : vector<16x96xf32> to vector<16x8xf32>
    %101 = arith.truncf %100 : vector<16x8xf32> to vector<16x8xbf16>
    %cst_31 = arith.constant dense<0.000000e+00> : vector<16x16xf32>
    %102 = tpu.matmul %97, %99, %cst_31 {dimension_numbers = #tpu.dot_dimension_numbers<[1], [1], [0], [0], [0, 0, 1, 0], [], []>} : vector<16x8xbf16>, vector<16x8xbf16>, vector<16x16xf32> -> vector<16x16xf32>
    %103 = arith.addf %102, %5 : vector<16x16xf32>
    %cst_32 = arith.constant dense<0xFF800000> : vector<16xf32>
    %104 = vector.multi_reduction <maximumf>, %103, %cst_32 [1] : vector<16x16xf32> to vector<16xf32>
    %105 = vector.shape_cast %104 : vector<16xf32> to vector<16x1xf32>
    %106 = vector.broadcast %105 : vector<16x1xf32> to vector<16x16xf32>
    %107 = arith.subf %103, %106 : vector<16x16xf32>
    %108 = math.exp %107 : vector<16x16xf32>
    %cst_33 = arith.constant dense<0.000000e+00> : vector<16xf32>
    %109 = vector.multi_reduction <add>, %108, %cst_33 [1] : vector<16x16xf32> to vector<16xf32>
    %110 = vector.shape_cast %109 : vector<16xf32> to vector<16x1xf32>
    %111 = tpu.reciprocal %110 {approx = true} : vector<16x1xf32> -> vector<16x1xf32>
    %112 = vector.broadcast %111 : vector<16x1xf32> to vector<16x16xf32>
    %113 = arith.mulf %108, %112 : vector<16x16xf32>
    %114 = arith.truncf %113 : vector<16x16xf32> to vector<16x16xbf16>
    %cst_34 = arith.constant dense<0.000000e+00> : vector<16x8xf32>
    %115 = tpu.matmul %114, %101, %cst_34 {dimension_numbers = #tpu.dot_dimension_numbers<[1], [0], [0], [1], [0, 0, 1, 1], [], []>} : vector<16x16xbf16>, vector<16x8xbf16>, vector<16x8xf32> -> vector<16x8xf32>
    %116 = tpu.concatenate %55, %75, %95, %115 in 1 : vector<16x8xf32>, vector<16x8xf32>, vector<16x8xf32>, vector<16x8xf32> -> vector<16x32xf32>
    %117 = arith.truncf %116 : vector<16x32xf32> to vector<16x32xbf16>
    %c768_35 = arith.constant 768 : index
    %c96_36 = arith.constant 96 : index
    %118 = vector.load %arg2[%c768_35, %c96_36] : memref<1056x128xbf16, #tpu.memory_space<vmem>>, vector<32x32xbf16>
    %cst_37 = arith.constant dense<0.000000e+00> : vector<16x32xf32>
    %119 = tpu.matmul %117, %118, %cst_37 {dimension_numbers = #tpu.dot_dimension_numbers<[1], [0], [0], [1], [0, 0, 1, 1], [], []>} : vector<16x32xbf16>, vector<32x32xbf16>, vector<16x32xf32> -> vector<16x32xf32>
    %120 = arith.addf %4, %119 : vector<16x32xf32>
    %c19_38 = arith.constant 19 : index
    %c96_39 = arith.constant 96 : index
    %121 = vector.load %arg3[%c19_38, %c96_39] : memref<24x128xf32, #tpu.memory_space<vmem>>, vector<1x32xf32>
    %122 = vector.broadcast %121 : vector<1x32xf32> to vector<16x32xf32>
    %123 = arith.addf %120, %122 : vector<16x32xf32>
    %cst_40 = arith.constant dense<0.000000e+00> : vector<16xf32>
    %124 = vector.multi_reduction <add>, %123, %cst_40 [1] : vector<16x32xf32> to vector<16xf32>
    %125 = vector.shape_cast %124 : vector<16xf32> to vector<16x1xf32>
    %cst_41 = arith.constant 3.200000e+01 : f32
    %126 = vector.broadcast %cst_41 : f32 to vector<16x1xf32>
    %127 = arith.divf %125, %126 : vector<16x1xf32>
    %128 = vector.broadcast %127 : vector<16x1xf32> to vector<16x32xf32>
    %129 = arith.subf %123, %128 : vector<16x32xf32>
    %130 = arith.mulf %129, %129 : vector<16x32xf32>
    %cst_42 = arith.constant dense<0.000000e+00> : vector<16xf32>
    %131 = vector.multi_reduction <add>, %130, %cst_42 [1] : vector<16x32xf32> to vector<16xf32>
    %132 = vector.shape_cast %131 : vector<16xf32> to vector<16x1xf32>
    %cst_43 = arith.constant 3.200000e+01 : f32
    %133 = vector.broadcast %cst_43 : f32 to vector<16x1xf32>
    %134 = arith.divf %132, %133 : vector<16x1xf32>
    %cst_44 = arith.constant 9.99999996E-13 : f32
    %135 = vector.broadcast %cst_44 : f32 to vector<16x1xf32>
    %136 = arith.addf %134, %135 : vector<16x1xf32>
    %137 = math.rsqrt %136 : vector<16x1xf32>
    %138 = vector.broadcast %137 : vector<16x1xf32> to vector<16x32xf32>
    %139 = arith.mulf %129, %138 : vector<16x32xf32>
    %140 = vector.broadcast %8 : vector<1x32xf32> to vector<16x32xf32>
    %141 = arith.mulf %139, %140 : vector<16x32xf32>
    %142 = vector.broadcast %9 : vector<1x32xf32> to vector<16x32xf32>
    %143 = arith.addf %141, %142 : vector<16x32xf32>
    %144 = arith.truncf %143 : vector<16x32xf32> to vector<16x32xbf16>
    %c800 = arith.constant 800 : index
    %c0_45 = arith.constant 0 : index
    %145 = vector.load %arg2[%c800, %c0_45] : memref<1056x128xbf16, #tpu.memory_space<vmem>>, vector<32x64xbf16>
    %cst_46 = arith.constant dense<0.000000e+00> : vector<16x64xf32>
    %146 = tpu.matmul %144, %145, %cst_46 {dimension_numbers = #tpu.dot_dimension_numbers<[1], [0], [0], [1], [0, 0, 1, 1], [], []>} : vector<16x32xbf16>, vector<32x64xbf16>, vector<16x64xf32> -> vector<16x64xf32>
    %c20 = arith.constant 20 : index
    %c0_47 = arith.constant 0 : index
    %147 = vector.load %arg3[%c20, %c0_47] : memref<24x128xf32, #tpu.memory_space<vmem>>, vector<1x64xf32>
    %148 = vector.broadcast %147 : vector<1x64xf32> to vector<16x64xf32>
    %149 = arith.addf %146, %148 : vector<16x64xf32>
    %cst_48 = arith.constant 5.000000e-01 : f32
    %150 = vector.broadcast %cst_48 : f32 to vector<16x64xf32>
    %151 = arith.mulf %150, %149 : vector<16x64xf32>
    %cst_49 = arith.constant 0.707106769 : f32
    %152 = vector.broadcast %cst_49 : f32 to vector<16x64xf32>
    %153 = arith.mulf %149, %152 : vector<16x64xf32>
    %154 = math.absf %153 : vector<16x64xf32>
    %cst_50 = arith.constant 0.327591091 : f32
    %155 = vector.broadcast %cst_50 : f32 to vector<16x64xf32>
    %156 = arith.mulf %155, %154 : vector<16x64xf32>
    %cst_51 = arith.constant 1.000000e+00 : f32
    %157 = vector.broadcast %cst_51 : f32 to vector<16x64xf32>
    %158 = arith.addf %157, %156 : vector<16x64xf32>
    %cst_52 = arith.constant 1.000000e+00 : f32
    %159 = vector.broadcast %cst_52 : f32 to vector<16x64xf32>
    %160 = arith.divf %159, %158 : vector<16x64xf32>
    %cst_53 = arith.constant 1.06140542 : f32
    %161 = vector.broadcast %cst_53 : f32 to vector<16x64xf32>
    %162 = arith.mulf %161, %160 : vector<16x64xf32>
    %cst_54 = arith.constant 1.45315206 : f32
    %163 = vector.broadcast %cst_54 : f32 to vector<16x64xf32>
    %164 = arith.subf %162, %163 : vector<16x64xf32>
    %165 = arith.mulf %164, %160 : vector<16x64xf32>
    %cst_55 = arith.constant 1.42141378 : f32
    %166 = vector.broadcast %cst_55 : f32 to vector<16x64xf32>
    %167 = arith.addf %165, %166 : vector<16x64xf32>
    %168 = arith.mulf %167, %160 : vector<16x64xf32>
    %cst_56 = arith.constant 0.284496725 : f32
    %169 = vector.broadcast %cst_56 : f32 to vector<16x64xf32>
    %170 = arith.subf %168, %169 : vector<16x64xf32>
    %171 = arith.mulf %170, %160 : vector<16x64xf32>
    %cst_57 = arith.constant 0.254829586 : f32
    %172 = vector.broadcast %cst_57 : f32 to vector<16x64xf32>
    %173 = arith.addf %171, %172 : vector<16x64xf32>
    %174 = arith.mulf %173, %160 : vector<16x64xf32>
    %cst_58 = arith.constant 0.000000e+00 : f32
    %175 = vector.broadcast %cst_58 : f32 to vector<16x64xf32>
    %176 = arith.subf %175, %154 : vector<16x64xf32>
    %177 = arith.mulf %176, %154 : vector<16x64xf32>
    %178 = math.exp %177 : vector<16x64xf32>
    %179 = arith.mulf %174, %178 : vector<16x64xf32>
    %cst_59 = arith.constant 1.000000e+00 : f32
    %180 = vector.broadcast %cst_59 : f32 to vector<16x64xf32>
    %181 = arith.subf %180, %179 : vector<16x64xf32>
    %cst_60 = arith.constant 0.000000e+00 : f32
    %182 = vector.broadcast %cst_60 : f32 to vector<16x64xf32>
    %183 = arith.cmpf olt, %153, %182 : vector<16x64xf32>
    %cst_61 = arith.constant 0.000000e+00 : f32
    %184 = vector.broadcast %cst_61 : f32 to vector<16x64xf32>
    %185 = arith.subf %184, %181 : vector<16x64xf32>
    %186 = arith.select %183, %185, %181 : vector<16x64xi1>, vector<16x64xf32>
    %cst_62 = arith.constant 1.000000e+00 : f32
    %187 = vector.broadcast %cst_62 : f32 to vector<16x64xf32>
    %188 = arith.addf %187, %186 : vector<16x64xf32>
    %189 = arith.mulf %151, %188 : vector<16x64xf32>
    %190 = arith.truncf %189 : vector<16x64xf32> to vector<16x64xbf16>
    %c832 = arith.constant 832 : index
    %c0_63 = arith.constant 0 : index
    %191 = vector.load %arg2[%c832, %c0_63] : memref<1056x128xbf16, #tpu.memory_space<vmem>>, vector<64x32xbf16>
    %cst_64 = arith.constant dense<0.000000e+00> : vector<16x32xf32>
    %192 = tpu.matmul %190, %191, %cst_64 {dimension_numbers = #tpu.dot_dimension_numbers<[1], [0], [0], [1], [0, 0, 1, 1], [], []>} : vector<16x64xbf16>, vector<64x32xbf16>, vector<16x32xf32> -> vector<16x32xf32>
    %193 = arith.addf %123, %192 : vector<16x32xf32>
    %c20_65 = arith.constant 20 : index
    %c64_66 = arith.constant 64 : index
    %194 = vector.load %arg3[%c20_65, %c64_66] : memref<24x128xf32, #tpu.memory_space<vmem>>, vector<1x32xf32>
    %195 = vector.broadcast %194 : vector<1x32xf32> to vector<16x32xf32>
    %196 = arith.addf %193, %195 : vector<16x32xf32>
    %c21 = arith.constant 21 : index
    %c0_67 = arith.constant 0 : index
    %197 = vector.load %arg3[%c21, %c0_67] : memref<24x128xf32, #tpu.memory_space<vmem>>, vector<1x32xf32>
    %c21_68 = arith.constant 21 : index
    %c32_69 = arith.constant 32 : index
    %198 = vector.load %arg3[%c21_68, %c32_69] : memref<24x128xf32, #tpu.memory_space<vmem>>, vector<1x32xf32>
    %c21_70 = arith.constant 21 : index
    %c64_71 = arith.constant 64 : index
    %199 = vector.load %arg3[%c21_70, %c64_71] : memref<24x128xf32, #tpu.memory_space<vmem>>, vector<1x32xf32>
    %c21_72 = arith.constant 21 : index
    %c96_73 = arith.constant 96 : index
    %200 = vector.load %arg3[%c21_72, %c96_73] : memref<24x128xf32, #tpu.memory_space<vmem>>, vector<1x32xf32>
    %cst_74 = arith.constant dense<0.000000e+00> : vector<16xf32>
    %201 = vector.multi_reduction <add>, %196, %cst_74 [1] : vector<16x32xf32> to vector<16xf32>
    %202 = vector.shape_cast %201 : vector<16xf32> to vector<16x1xf32>
    %cst_75 = arith.constant 3.200000e+01 : f32
    %203 = vector.broadcast %cst_75 : f32 to vector<16x1xf32>
    %204 = arith.divf %202, %203 : vector<16x1xf32>
    %205 = vector.broadcast %204 : vector<16x1xf32> to vector<16x32xf32>
    %206 = arith.subf %196, %205 : vector<16x32xf32>
    %207 = arith.mulf %206, %206 : vector<16x32xf32>
    %cst_76 = arith.constant dense<0.000000e+00> : vector<16xf32>
    %208 = vector.multi_reduction <add>, %207, %cst_76 [1] : vector<16x32xf32> to vector<16xf32>
    %209 = vector.shape_cast %208 : vector<16xf32> to vector<16x1xf32>
    %cst_77 = arith.constant 3.200000e+01 : f32
    %210 = vector.broadcast %cst_77 : f32 to vector<16x1xf32>
    %211 = arith.divf %209, %210 : vector<16x1xf32>
    %cst_78 = arith.constant 9.99999996E-13 : f32
    %212 = vector.broadcast %cst_78 : f32 to vector<16x1xf32>
    %213 = arith.addf %211, %212 : vector<16x1xf32>
    %214 = math.rsqrt %213 : vector<16x1xf32>
    %215 = vector.broadcast %214 : vector<16x1xf32> to vector<16x32xf32>
    %216 = arith.mulf %206, %215 : vector<16x32xf32>
    %217 = vector.broadcast %197 : vector<1x32xf32> to vector<16x32xf32>
    %218 = arith.mulf %216, %217 : vector<16x32xf32>
    %219 = vector.broadcast %198 : vector<1x32xf32> to vector<16x32xf32>
    %220 = arith.addf %218, %219 : vector<16x32xf32>
    %221 = arith.truncf %220 : vector<16x32xf32> to vector<16x32xbf16>
    %c896 = arith.constant 896 : index
    %c0_79 = arith.constant 0 : index
    %222 = vector.load %arg2[%c896, %c0_79] : memref<1056x128xbf16, #tpu.memory_space<vmem>>, vector<32x96xbf16>
    %cst_80 = arith.constant dense<0.000000e+00> : vector<16x96xf32>
    %223 = tpu.matmul %221, %222, %cst_80 {dimension_numbers = #tpu.dot_dimension_numbers<[1], [0], [0], [1], [0, 0, 1, 1], [], []>} : vector<16x32xbf16>, vector<32x96xbf16>, vector<16x96xf32> -> vector<16x96xf32>
    %c22 = arith.constant 22 : index
    %c0_81 = arith.constant 0 : index
    %224 = vector.load %arg3[%c22, %c0_81] : memref<24x128xf32, #tpu.memory_space<vmem>>, vector<1x96xf32>
    %225 = vector.broadcast %224 : vector<1x96xf32> to vector<16x96xf32>
    %226 = arith.addf %223, %225 : vector<16x96xf32>
    %227 = vector.extract_strided_slice %226 {offsets = [0, 0], sizes = [16, 8], strides = [1, 1]} : vector<16x96xf32> to vector<16x8xf32>
    %228 = arith.truncf %227 : vector<16x8xf32> to vector<16x8xbf16>
    %229 = vector.extract_strided_slice %226 {offsets = [0, 32], sizes = [16, 8], strides = [1, 1]} : vector<16x96xf32> to vector<16x8xf32>
    %230 = arith.truncf %229 : vector<16x8xf32> to vector<16x8xbf16>
    %231 = vector.extract_strided_slice %226 {offsets = [0, 64], sizes = [16, 8], strides = [1, 1]} : vector<16x96xf32> to vector<16x8xf32>
    %232 = arith.truncf %231 : vector<16x8xf32> to vector<16x8xbf16>
    %cst_82 = arith.constant dense<0.000000e+00> : vector<16x16xf32>
    %233 = tpu.matmul %228, %230, %cst_82 {dimension_numbers = #tpu.dot_dimension_numbers<[1], [1], [0], [0], [0, 0, 1, 0], [], []>} : vector<16x8xbf16>, vector<16x8xbf16>, vector<16x16xf32> -> vector<16x16xf32>
    %234 = arith.addf %233, %5 : vector<16x16xf32>
    %cst_83 = arith.constant dense<0xFF800000> : vector<16xf32>
    %235 = vector.multi_reduction <maximumf>, %234, %cst_83 [1] : vector<16x16xf32> to vector<16xf32>
    %236 = vector.shape_cast %235 : vector<16xf32> to vector<16x1xf32>
    %237 = vector.broadcast %236 : vector<16x1xf32> to vector<16x16xf32>
    %238 = arith.subf %234, %237 : vector<16x16xf32>
    %239 = math.exp %238 : vector<16x16xf32>
    %cst_84 = arith.constant dense<0.000000e+00> : vector<16xf32>
    %240 = vector.multi_reduction <add>, %239, %cst_84 [1] : vector<16x16xf32> to vector<16xf32>
    %241 = vector.shape_cast %240 : vector<16xf32> to vector<16x1xf32>
    %242 = tpu.reciprocal %241 {approx = true} : vector<16x1xf32> -> vector<16x1xf32>
    %243 = vector.broadcast %242 : vector<16x1xf32> to vector<16x16xf32>
    %244 = arith.mulf %239, %243 : vector<16x16xf32>
    %245 = arith.truncf %244 : vector<16x16xf32> to vector<16x16xbf16>
    %cst_85 = arith.constant dense<0.000000e+00> : vector<16x8xf32>
    %246 = tpu.matmul %245, %232, %cst_85 {dimension_numbers = #tpu.dot_dimension_numbers<[1], [0], [0], [1], [0, 0, 1, 1], [], []>} : vector<16x16xbf16>, vector<16x8xbf16>, vector<16x8xf32> -> vector<16x8xf32>
    %247 = vector.extract_strided_slice %226 {offsets = [0, 8], sizes = [16, 8], strides = [1, 1]} : vector<16x96xf32> to vector<16x8xf32>
    %248 = arith.truncf %247 : vector<16x8xf32> to vector<16x8xbf16>
    %249 = vector.extract_strided_slice %226 {offsets = [0, 40], sizes = [16, 8], strides = [1, 1]} : vector<16x96xf32> to vector<16x8xf32>
    %250 = arith.truncf %249 : vector<16x8xf32> to vector<16x8xbf16>
    %251 = vector.extract_strided_slice %226 {offsets = [0, 72], sizes = [16, 8], strides = [1, 1]} : vector<16x96xf32> to vector<16x8xf32>
    %252 = arith.truncf %251 : vector<16x8xf32> to vector<16x8xbf16>
    %cst_86 = arith.constant dense<0.000000e+00> : vector<16x16xf32>
    %253 = tpu.matmul %248, %250, %cst_86 {dimension_numbers = #tpu.dot_dimension_numbers<[1], [1], [0], [0], [0, 0, 1, 0], [], []>} : vector<16x8xbf16>, vector<16x8xbf16>, vector<16x16xf32> -> vector<16x16xf32>
    %254 = arith.addf %253, %5 : vector<16x16xf32>
    %cst_87 = arith.constant dense<0xFF800000> : vector<16xf32>
    %255 = vector.multi_reduction <maximumf>, %254, %cst_87 [1] : vector<16x16xf32> to vector<16xf32>
    %256 = vector.shape_cast %255 : vector<16xf32> to vector<16x1xf32>
    %257 = vector.broadcast %256 : vector<16x1xf32> to vector<16x16xf32>
    %258 = arith.subf %254, %257 : vector<16x16xf32>
    %259 = math.exp %258 : vector<16x16xf32>
    %cst_88 = arith.constant dense<0.000000e+00> : vector<16xf32>
    %260 = vector.multi_reduction <add>, %259, %cst_88 [1] : vector<16x16xf32> to vector<16xf32>
    %261 = vector.shape_cast %260 : vector<16xf32> to vector<16x1xf32>
    %262 = tpu.reciprocal %261 {approx = true} : vector<16x1xf32> -> vector<16x1xf32>
    %263 = vector.broadcast %262 : vector<16x1xf32> to vector<16x16xf32>
    %264 = arith.mulf %259, %263 : vector<16x16xf32>
    %265 = arith.truncf %264 : vector<16x16xf32> to vector<16x16xbf16>
    %cst_89 = arith.constant dense<0.000000e+00> : vector<16x8xf32>
    %266 = tpu.matmul %265, %252, %cst_89 {dimension_numbers = #tpu.dot_dimension_numbers<[1], [0], [0], [1], [0, 0, 1, 1], [], []>} : vector<16x16xbf16>, vector<16x8xbf16>, vector<16x8xf32> -> vector<16x8xf32>
    %267 = vector.extract_strided_slice %226 {offsets = [0, 16], sizes = [16, 8], strides = [1, 1]} : vector<16x96xf32> to vector<16x8xf32>
    %268 = arith.truncf %267 : vector<16x8xf32> to vector<16x8xbf16>
    %269 = vector.extract_strided_slice %226 {offsets = [0, 48], sizes = [16, 8], strides = [1, 1]} : vector<16x96xf32> to vector<16x8xf32>
    %270 = arith.truncf %269 : vector<16x8xf32> to vector<16x8xbf16>
    %271 = vector.extract_strided_slice %226 {offsets = [0, 80], sizes = [16, 8], strides = [1, 1]} : vector<16x96xf32> to vector<16x8xf32>
    %272 = arith.truncf %271 : vector<16x8xf32> to vector<16x8xbf16>
    %cst_90 = arith.constant dense<0.000000e+00> : vector<16x16xf32>
    %273 = tpu.matmul %268, %270, %cst_90 {dimension_numbers = #tpu.dot_dimension_numbers<[1], [1], [0], [0], [0, 0, 1, 0], [], []>} : vector<16x8xbf16>, vector<16x8xbf16>, vector<16x16xf32> -> vector<16x16xf32>
    %274 = arith.addf %273, %5 : vector<16x16xf32>
    %cst_91 = arith.constant dense<0xFF800000> : vector<16xf32>
    %275 = vector.multi_reduction <maximumf>, %274, %cst_91 [1] : vector<16x16xf32> to vector<16xf32>
    %276 = vector.shape_cast %275 : vector<16xf32> to vector<16x1xf32>
    %277 = vector.broadcast %276 : vector<16x1xf32> to vector<16x16xf32>
    %278 = arith.subf %274, %277 : vector<16x16xf32>
    %279 = math.exp %278 : vector<16x16xf32>
    %cst_92 = arith.constant dense<0.000000e+00> : vector<16xf32>
    %280 = vector.multi_reduction <add>, %279, %cst_92 [1] : vector<16x16xf32> to vector<16xf32>
    %281 = vector.shape_cast %280 : vector<16xf32> to vector<16x1xf32>
    %282 = tpu.reciprocal %281 {approx = true} : vector<16x1xf32> -> vector<16x1xf32>
    %283 = vector.broadcast %282 : vector<16x1xf32> to vector<16x16xf32>
    %284 = arith.mulf %279, %283 : vector<16x16xf32>
    %285 = arith.truncf %284 : vector<16x16xf32> to vector<16x16xbf16>
    %cst_93 = arith.constant dense<0.000000e+00> : vector<16x8xf32>
    %286 = tpu.matmul %285, %272, %cst_93 {dimension_numbers = #tpu.dot_dimension_numbers<[1], [0], [0], [1], [0, 0, 1, 1], [], []>} : vector<16x16xbf16>, vector<16x8xbf16>, vector<16x8xf32> -> vector<16x8xf32>
    %287 = vector.extract_strided_slice %226 {offsets = [0, 24], sizes = [16, 8], strides = [1, 1]} : vector<16x96xf32> to vector<16x8xf32>
    %288 = arith.truncf %287 : vector<16x8xf32> to vector<16x8xbf16>
    %289 = vector.extract_strided_slice %226 {offsets = [0, 56], sizes = [16, 8], strides = [1, 1]} : vector<16x96xf32> to vector<16x8xf32>
    %290 = arith.truncf %289 : vector<16x8xf32> to vector<16x8xbf16>
    %291 = vector.extract_strided_slice %226 {offsets = [0, 88], sizes = [16, 8], strides = [1, 1]} : vector<16x96xf32> to vector<16x8xf32>
    %292 = arith.truncf %291 : vector<16x8xf32> to vector<16x8xbf16>
    %cst_94 = arith.constant dense<0.000000e+00> : vector<16x16xf32>
    %293 = tpu.matmul %288, %290, %cst_94 {dimension_numbers = #tpu.dot_dimension_numbers<[1], [1], [0], [0], [0, 0, 1, 0], [], []>} : vector<16x8xbf16>, vector<16x8xbf16>, vector<16x16xf32> -> vector<16x16xf32>
    %294 = arith.addf %293, %5 : vector<16x16xf32>
    %cst_95 = arith.constant dense<0xFF800000> : vector<16xf32>
    %295 = vector.multi_reduction <maximumf>, %294, %cst_95 [1] : vector<16x16xf32> to vector<16xf32>
    %296 = vector.shape_cast %295 : vector<16xf32> to vector<16x1xf32>
    %297 = vector.broadcast %296 : vector<16x1xf32> to vector<16x16xf32>
    %298 = arith.subf %294, %297 : vector<16x16xf32>
    %299 = math.exp %298 : vector<16x16xf32>
    %cst_96 = arith.constant dense<0.000000e+00> : vector<16xf32>
    %300 = vector.multi_reduction <add>, %299, %cst_96 [1] : vector<16x16xf32> to vector<16xf32>
    %301 = vector.shape_cast %300 : vector<16xf32> to vector<16x1xf32>
    %302 = tpu.reciprocal %301 {approx = true} : vector<16x1xf32> -> vector<16x1xf32>
    %303 = vector.broadcast %302 : vector<16x1xf32> to vector<16x16xf32>
    %304 = arith.mulf %299, %303 : vector<16x16xf32>
    %305 = arith.truncf %304 : vector<16x16xf32> to vector<16x16xbf16>
    %cst_97 = arith.constant dense<0.000000e+00> : vector<16x8xf32>
    %306 = tpu.matmul %305, %292, %cst_97 {dimension_numbers = #tpu.dot_dimension_numbers<[1], [0], [0], [1], [0, 0, 1, 1], [], []>} : vector<16x16xbf16>, vector<16x8xbf16>, vector<16x8xf32> -> vector<16x8xf32>
    %307 = tpu.concatenate %246, %266, %286, %306 in 1 : vector<16x8xf32>, vector<16x8xf32>, vector<16x8xf32>, vector<16x8xf32> -> vector<16x32xf32>
    %308 = arith.truncf %307 : vector<16x32xf32> to vector<16x32xbf16>
    %c896_98 = arith.constant 896 : index
    %c96_99 = arith.constant 96 : index
    %309 = vector.load %arg2[%c896_98, %c96_99] : memref<1056x128xbf16, #tpu.memory_space<vmem>>, vector<32x32xbf16>
    %cst_100 = arith.constant dense<0.000000e+00> : vector<16x32xf32>
    %310 = tpu.matmul %308, %309, %cst_100 {dimension_numbers = #tpu.dot_dimension_numbers<[1], [0], [0], [1], [0, 0, 1, 1], [], []>} : vector<16x32xbf16>, vector<32x32xbf16>, vector<16x32xf32> -> vector<16x32xf32>
    %311 = arith.addf %196, %310 : vector<16x32xf32>
    %c22_101 = arith.constant 22 : index
    %c96_102 = arith.constant 96 : index
    %312 = vector.load %arg3[%c22_101, %c96_102] : memref<24x128xf32, #tpu.memory_space<vmem>>, vector<1x32xf32>
    %313 = vector.broadcast %312 : vector<1x32xf32> to vector<16x32xf32>
    %314 = arith.addf %311, %313 : vector<16x32xf32>
    %cst_103 = arith.constant dense<0.000000e+00> : vector<16xf32>
    %315 = vector.multi_reduction <add>, %314, %cst_103 [1] : vector<16x32xf32> to vector<16xf32>
    %316 = vector.shape_cast %315 : vector<16xf32> to vector<16x1xf32>
    %cst_104 = arith.constant 3.200000e+01 : f32
    %317 = vector.broadcast %cst_104 : f32 to vector<16x1xf32>
    %318 = arith.divf %316, %317 : vector<16x1xf32>
    %319 = vector.broadcast %318 : vector<16x1xf32> to vector<16x32xf32>
    %320 = arith.subf %314, %319 : vector<16x32xf32>
    %321 = arith.mulf %320, %320 : vector<16x32xf32>
    %cst_105 = arith.constant dense<0.000000e+00> : vector<16xf32>
    %322 = vector.multi_reduction <add>, %321, %cst_105 [1] : vector<16x32xf32> to vector<16xf32>
    %323 = vector.shape_cast %322 : vector<16xf32> to vector<16x1xf32>
    %cst_106 = arith.constant 3.200000e+01 : f32
    %324 = vector.broadcast %cst_106 : f32 to vector<16x1xf32>
    %325 = arith.divf %323, %324 : vector<16x1xf32>
    %cst_107 = arith.constant 9.99999996E-13 : f32
    %326 = vector.broadcast %cst_107 : f32 to vector<16x1xf32>
    %327 = arith.addf %325, %326 : vector<16x1xf32>
    %328 = math.rsqrt %327 : vector<16x1xf32>
    %329 = vector.broadcast %328 : vector<16x1xf32> to vector<16x32xf32>
    %330 = arith.mulf %320, %329 : vector<16x32xf32>
    %331 = vector.broadcast %199 : vector<1x32xf32> to vector<16x32xf32>
    %332 = arith.mulf %330, %331 : vector<16x32xf32>
    %333 = vector.broadcast %200 : vector<1x32xf32> to vector<16x32xf32>
    %334 = arith.addf %332, %333 : vector<16x32xf32>
    %335 = arith.truncf %334 : vector<16x32xf32> to vector<16x32xbf16>
    %c928 = arith.constant 928 : index
    %c0_108 = arith.constant 0 : index
    %336 = vector.load %arg2[%c928, %c0_108] : memref<1056x128xbf16, #tpu.memory_space<vmem>>, vector<32x64xbf16>
    %cst_109 = arith.constant dense<0.000000e+00> : vector<16x64xf32>
    %337 = tpu.matmul %335, %336, %cst_109 {dimension_numbers = #tpu.dot_dimension_numbers<[1], [0], [0], [1], [0, 0, 1, 1], [], []>} : vector<16x32xbf16>, vector<32x64xbf16>, vector<16x64xf32> -> vector<16x64xf32>
    %c23 = arith.constant 23 : index
    %c0_110 = arith.constant 0 : index
    %338 = vector.load %arg3[%c23, %c0_110] : memref<24x128xf32, #tpu.memory_space<vmem>>, vector<1x64xf32>
    %339 = vector.broadcast %338 : vector<1x64xf32> to vector<16x64xf32>
    %340 = arith.addf %337, %339 : vector<16x64xf32>
    %cst_111 = arith.constant 5.000000e-01 : f32
    %341 = vector.broadcast %cst_111 : f32 to vector<16x64xf32>
    %342 = arith.mulf %341, %340 : vector<16x64xf32>
    %cst_112 = arith.constant 0.707106769 : f32
    %343 = vector.broadcast %cst_112 : f32 to vector<16x64xf32>
    %344 = arith.mulf %340, %343 : vector<16x64xf32>
    %345 = math.absf %344 : vector<16x64xf32>
    %cst_113 = arith.constant 0.327591091 : f32
    %346 = vector.broadcast %cst_113 : f32 to vector<16x64xf32>
    %347 = arith.mulf %346, %345 : vector<16x64xf32>
    %cst_114 = arith.constant 1.000000e+00 : f32
    %348 = vector.broadcast %cst_114 : f32 to vector<16x64xf32>
    %349 = arith.addf %348, %347 : vector<16x64xf32>
    %cst_115 = arith.constant 1.000000e+00 : f32
    %350 = vector.broadcast %cst_115 : f32 to vector<16x64xf32>
    %351 = arith.divf %350, %349 : vector<16x64xf32>
    %cst_116 = arith.constant 1.06140542 : f32
    %352 = vector.broadcast %cst_116 : f32 to vector<16x64xf32>
    %353 = arith.mulf %352, %351 : vector<16x64xf32>
    %cst_117 = arith.constant 1.45315206 : f32
    %354 = vector.broadcast %cst_117 : f32 to vector<16x64xf32>
    %355 = arith.subf %353, %354 : vector<16x64xf32>
    %356 = arith.mulf %355, %351 : vector<16x64xf32>
    %cst_118 = arith.constant 1.42141378 : f32
    %357 = vector.broadcast %cst_118 : f32 to vector<16x64xf32>
    %358 = arith.addf %356, %357 : vector<16x64xf32>
    %359 = arith.mulf %358, %351 : vector<16x64xf32>
    %cst_119 = arith.constant 0.284496725 : f32
    %360 = vector.broadcast %cst_119 : f32 to vector<16x64xf32>
    %361 = arith.subf %359, %360 : vector<16x64xf32>
    %362 = arith.mulf %361, %351 : vector<16x64xf32>
    %cst_120 = arith.constant 0.254829586 : f32
    %363 = vector.broadcast %cst_120 : f32 to vector<16x64xf32>
    %364 = arith.addf %362, %363 : vector<16x64xf32>
    %365 = arith.mulf %364, %351 : vector<16x64xf32>
    %cst_121 = arith.constant 0.000000e+00 : f32
    %366 = vector.broadcast %cst_121 : f32 to vector<16x64xf32>
    %367 = arith.subf %366, %345 : vector<16x64xf32>
    %368 = arith.mulf %367, %345 : vector<16x64xf32>
    %369 = math.exp %368 : vector<16x64xf32>
    %370 = arith.mulf %365, %369 : vector<16x64xf32>
    %cst_122 = arith.constant 1.000000e+00 : f32
    %371 = vector.broadcast %cst_122 : f32 to vector<16x64xf32>
    %372 = arith.subf %371, %370 : vector<16x64xf32>
    %cst_123 = arith.constant 0.000000e+00 : f32
    %373 = vector.broadcast %cst_123 : f32 to vector<16x64xf32>
    %374 = arith.cmpf olt, %344, %373 : vector<16x64xf32>
    %cst_124 = arith.constant 0.000000e+00 : f32
    %375 = vector.broadcast %cst_124 : f32 to vector<16x64xf32>
    %376 = arith.subf %375, %372 : vector<16x64xf32>
    %377 = arith.select %374, %376, %372 : vector<16x64xi1>, vector<16x64xf32>
    %cst_125 = arith.constant 1.000000e+00 : f32
    %378 = vector.broadcast %cst_125 : f32 to vector<16x64xf32>
    %379 = arith.addf %378, %377 : vector<16x64xf32>
    %380 = arith.mulf %342, %379 : vector<16x64xf32>
    %381 = arith.truncf %380 : vector<16x64xf32> to vector<16x64xbf16>
    %c960 = arith.constant 960 : index
    %c0_126 = arith.constant 0 : index
    %382 = vector.load %arg2[%c960, %c0_126] : memref<1056x128xbf16, #tpu.memory_space<vmem>>, vector<64x32xbf16>
    %cst_127 = arith.constant dense<0.000000e+00> : vector<16x32xf32>
    %383 = tpu.matmul %381, %382, %cst_127 {dimension_numbers = #tpu.dot_dimension_numbers<[1], [0], [0], [1], [0, 0, 1, 1], [], []>} : vector<16x64xbf16>, vector<64x32xbf16>, vector<16x32xf32> -> vector<16x32xf32>
    %384 = arith.addf %314, %383 : vector<16x32xf32>
    %c23_128 = arith.constant 23 : index
    %c64_129 = arith.constant 64 : index
    %385 = vector.load %arg3[%c23_128, %c64_129] : memref<24x128xf32, #tpu.memory_space<vmem>>, vector<1x32xf32>
    %386 = vector.broadcast %385 : vector<1x32xf32> to vector<16x32xf32>
    %387 = arith.addf %384, %386 : vector<16x32xf32>
    %c16 = arith.constant 16 : index
    %c0_130 = arith.constant 0 : index
    %388 = vector.load %arg3[%c16, %c0_130] : memref<24x128xf32, #tpu.memory_space<vmem>>, vector<1x32xf32>
    %c16_131 = arith.constant 16 : index
    %c32_132 = arith.constant 32 : index
    %389 = vector.load %arg3[%c16_131, %c32_132] : memref<24x128xf32, #tpu.memory_space<vmem>>, vector<1x32xf32>
    %cst_133 = arith.constant dense<0.000000e+00> : vector<16xf32>
    %390 = vector.multi_reduction <add>, %387, %cst_133 [1] : vector<16x32xf32> to vector<16xf32>
    %391 = vector.shape_cast %390 : vector<16xf32> to vector<16x1xf32>
    %cst_134 = arith.constant 3.200000e+01 : f32
    %392 = vector.broadcast %cst_134 : f32 to vector<16x1xf32>
    %393 = arith.divf %391, %392 : vector<16x1xf32>
    %394 = vector.broadcast %393 : vector<16x1xf32> to vector<16x32xf32>
    %395 = arith.subf %387, %394 : vector<16x32xf32>
    %396 = arith.mulf %395, %395 : vector<16x32xf32>
    %cst_135 = arith.constant dense<0.000000e+00> : vector<16xf32>
    %397 = vector.multi_reduction <add>, %396, %cst_135 [1] : vector<16x32xf32> to vector<16xf32>
    %398 = vector.shape_cast %397 : vector<16xf32> to vector<16x1xf32>
    %cst_136 = arith.constant 3.200000e+01 : f32
    %399 = vector.broadcast %cst_136 : f32 to vector<16x1xf32>
    %400 = arith.divf %398, %399 : vector<16x1xf32>
    %cst_137 = arith.constant 9.99999996E-13 : f32
    %401 = vector.broadcast %cst_137 : f32 to vector<16x1xf32>
    %402 = arith.addf %400, %401 : vector<16x1xf32>
    %403 = math.rsqrt %402 : vector<16x1xf32>
    %404 = vector.broadcast %403 : vector<16x1xf32> to vector<16x32xf32>
    %405 = arith.mulf %395, %404 : vector<16x32xf32>
    %406 = vector.broadcast %388 : vector<1x32xf32> to vector<16x32xf32>
    %407 = arith.mulf %405, %406 : vector<16x32xf32>
    %408 = vector.broadcast %389 : vector<1x32xf32> to vector<16x32xf32>
    %409 = arith.addf %407, %408 : vector<16x32xf32>
    %410 = arith.truncf %409 : vector<16x32xf32> to vector<16x32xbf16>
    %c1024 = arith.constant 1024 : index
    %c0_138 = arith.constant 0 : index
    %411 = vector.load %arg2[%c1024, %c0_138] : memref<1056x128xbf16, #tpu.memory_space<vmem>>, vector<32x128xbf16>
    %cst_139 = arith.constant dense<0.000000e+00> : vector<16x128xf32>
    %412 = tpu.matmul %410, %411, %cst_139 {dimension_numbers = #tpu.dot_dimension_numbers<[1], [0], [0], [1], [0, 0, 1, 1], [], []>} : vector<16x32xbf16>, vector<32x128xbf16>, vector<16x128xf32> -> vector<16x128xf32>
    %c17 = arith.constant 17 : index
    %c0_140 = arith.constant 0 : index
    %413 = vector.load %arg3[%c17, %c0_140] : memref<24x128xf32, #tpu.memory_space<vmem>>, vector<1x128xf32>
    %414 = vector.broadcast %413 : vector<1x128xf32> to vector<16x128xf32>
    %415 = arith.addf %412, %414 : vector<16x128xf32>
    %c0_141 = arith.constant 0 : index
    %c0_142 = arith.constant 0 : index
    %416 = vector.load %arg4[%c0_141, %c0_142] : memref<16x128xf32, #tpu.memory_space<vmem>>, vector<16x128xf32>
    tpu.vector_store %arg4[%c0_141, %c0_142], %415 {strides = array<i32>} : memref<16x128xf32, #tpu.memory_space<vmem>>, vector<16x128xf32>,
    return
  }
  func.func @transform_0(%arg0: i32) -> (i32, i32) {
    %c0_i32 = arith.constant 0 : i32
    %c0_i32_0 = arith.constant 0 : i32
    return %arg0, %c0_i32 : i32, i32
  }
  func.func @transform_1(%arg0: i32) -> (i32, i32) {
    %c0_i32 = arith.constant 0 : i32
    %c0_i32_0 = arith.constant 0 : i32
    %c0_i32_1 = arith.constant 0 : i32
    return %c0_i32, %c0_i32_0 : i32, i32
  }
  func.func @transform_2(%arg0: i32) -> (i32, i32) {
    %c0_i32 = arith.constant 0 : i32
    %c0_i32_0 = arith.constant 0 : i32
    %c0_i32_1 = arith.constant 0 : i32
    return %c0_i32, %c0_i32_0 : i32, i32
  }
  func.func @transform_3(%arg0: i32) -> (i32, i32) {
    %c0_i32 = arith.constant 0 : i32
    %c0_i32_0 = arith.constant 0 : i32
    return %arg0, %c0_i32 : i32, i32
  }
}

</mosaic_0001>

<bundles_post_ra>
// kernel: vit_forward.1
= control target key start
LH: loop header
LB: loop body
LE: loop exit
PB: predicated region body
PF: predicated region fallthrough
CT: control target
= control target key end

     0   :  { %vm522_vm0 = vcmask 261120   ;;  %s2483_s29 = smov 96   ;;  %s2484_s9 = smov 120   ;;  %vm631_vm8 = vcmask 64512   ;;  %vm652_vm9 = vcmask 130048   ;;  %vm925_vm10 = vcmask 195584   ;;  %s3140_s1 = inlined_call_operand.vmem [shape: bf16[1056,128], index: 1, kind: input, shape index: {}]   ;;  %s3141_s2 = inlined_call_operand.vmem [shape: f32[24,128], index: 2, kind: input, shape index: {}]   ;;  %s3142_s0 = inlined_call_operand.vmem [shape: bf16[16,768], index: 0, kind: input, shape index: {}]   ;;  %s3143_s3 = inlined_call_operand.vmem [shape: f32[16,128], index: 3, kind: output, shape index: {}]  }
   0x1   :  { %v2267_v0 = vld [vmem:[%s3140_s1 + $0x38] sm:$0xff]  ;;  %v2266_v4 = vld [vmem:[%s3140_s1 + $0x30] sm:$0xff]  ;;  %v2265_v8 = vld [vmem:[%s3140_s1 + $0x28] sm:$0xff]  ;;  %s2485_s10 = smov 88   ;;  %s2486_s11 = smov 104  }
   0x2   :  { %v2275_v1 = vld [vmem:[%s3140_s1 + $0x78] sm:$0xff]  ;;  %437 = vmatpush.bf16.msra.mxu0 %v2267_v0  ;;  %v2274_v5 = vld [vmem:[%s3140_s1 + $0x70] sm:$0xff]  ;;  %v2273_v9 = vld [vmem:[%s3140_s1 + $0x68] sm:$0xff]  ;;  %s2487_s12 = smov 64   ;;  %s2488_s13 = smov 80  }
   0x3   :  { %v2283_v2 = vld [vmem:[%s3140_s1 + $0xb8] sm:$0xff]  ;;  %451 = vmatpush.bf16.msra.mxu1 %v2275_v1  ;;  %v2282_v6 = vld [vmem:[%s3140_s1 + $0xb0] sm:$0xff]  ;;  %v2281_v10 = vld [vmem:[%s3140_s1 + $0xa8] sm:$0xff]  ;;  %s2489_s14 = smov 72   ;;  %s2490_s15 = smov 112  }
   0x4   :  { %v2291_v3 = vld [vmem:[%s3140_s1 + $0xf8] sm:$0xff]  ;;  %465 = vmatpush.bf16.msra.mxu2 %v2283_v2  ;;  %v2290_v7 = vld [vmem:[%s3140_s1 + $0xf0] sm:$0xff]  ;;  %v2289_v11 = vld [vmem:[%s3140_s1 + $0xe8] sm:$0xff]  ;;  %s2491_s16 = smov 56   ;;  %s2492_s17 = smov 48  }
   0x5   :  { %479 = vmatpush.bf16.msra.mxu3 %v2291_v3  ;;  %v2264_v12 = vld [vmem:[%s3140_s1 + $0x20] sm:$0xff]  ;;  %v2263_v16 = vld [vmem:[%s3140_s1 + $0x18] sm:$0xff]  ;;  %v2262_v20 = vld [vmem:[%s3140_s1 + $0x10] sm:$0xff]  ;;  %s2493_s18 = smov 40   ;;  %s2494_s19 = smov 32  }
   0x6   :  { %438 = vmatpush.bf16.msra.mxu0 %v2266_v4  ;;  %v2272_v13 = vld [vmem:[%s3140_s1 + $0x60] sm:$0xff]  ;;  %v2271_v17 = vld [vmem:[%s3140_s1 + $0x58] sm:$0xff]  ;;  %v2270_v21 = vld [vmem:[%s3140_s1 + $0x50] sm:$0xff]  ;;  %s2495_s20 = smov 8   ;;  %s2496_s21 = smov 16  }
   0x7   :  { %452 = vmatpush.bf16.msra.mxu1 %v2274_v5  ;;  %v2280_v14 = vld [vmem:[%s3140_s1 + $0xa0] sm:$0xff]  ;;  %v2279_v18 = vld [vmem:[%s3140_s1 + $0x98] sm:$0xff]  ;;  %v2278_v22 = vld [vmem:[%s3140_s1 + $0x90] sm:$0xff]  ;;  %s2497_s22 = smov 24  }
   0x8   :  { %466 = vmatpush.bf16.msra.mxu2 %v2282_v6  ;;  %v2288_v15 = vld [vmem:[%s3140_s1 + $0xe0] sm:$0xff]  ;;  %v2287_v19 = vld [vmem:[%s3140_s1 + $0xd8] sm:$0xff]  ;;  %v2286_v23 = vld [vmem:[%s3140_s1 + $0xd0] sm:$0xff] }
   0x9   :  { %480 = vmatpush.bf16.msra.mxu3 %v2290_v7  ;;  %v2261_v24 = vld [vmem:[%s3140_s1 + $0x8] sm:$0xff]  ;;  %v2260_v28 = vld [vmem:[%s3140_s1] sm:$0xff]  ;;  %v2257_v31 = vld [vmem:[%s3142_s0 + $0x14] sm:$0xf0] }
   0xa   :  { %439 = vmatpush.bf16.msra.mxu0 %v2265_v8  ;;  %v2269_v25 = vld [vmem:[%s3140_s1 + $0x48] sm:$0xff]  ;;  %v2268_v29 = vld [vmem:[%s3140_s1 + $0x40] sm:$0xff]  ;;  %v1937_v33 = vld [vmem:[%s3142_s0 + $0x18] sm:$0xf0] }
   0xb   :  { %453 = vmatpush.bf16.msra.mxu1 %v2273_v9  ;;  %v2277_v26 = vld [vmem:[%s3140_s1 + $0x88] sm:$0xff]  ;;  %v1935_v30 = vld [vmem:[%s3142_s0] sm:$0xf]  ;;  %v2254_v32 = vld [vmem:[%s3142_s0 + $0x4] sm:$0xf] }
   0xc   :  { %467 = vmatpush.bf16.msra.mxu2 %v2281_v10  ;;  %v2285_v27 = vld [vmem:[%s3140_s1 + $0xc8] sm:$0xff]  ;;  %v2299_v34 = vld [vmem:[%s3140_s1 + $0x138] sm:$0xff]  ;;  %v2276_v36 = vld [vmem:[%s3140_s1 + $0x80] sm:$0xff]  ;;  %v1936_v40 = vor.u32 %v2257_v31, %v1935_v30  ;;  %v1940_v43 = vor.u32 %v2254_v32, %v1937_v33  ;;  %v2482_v30 = vmov 32.0  }
   0xd   :  { %481 = vmatpush.bf16.msra.mxu3 %v2289_v11  ;;  %v2307_v35 = vld [vmem:[%s3140_s1 + $0x178] sm:$0xff]  ;;  %v2284_v37 = vld [vmem:[%s3140_s1 + $0xc0] sm:$0xff]  ;;  %v1943_v38 = vld [vmem:[%s3142_s0 + $0x8] sm:$0xf]  ;;  %2380 = vrcp.f32 %v2482_v30 }
   0xe   :  { %440 = vmatpush.bf16.msra.mxu0 %v2264_v12  ;;  %v2258_v39 = vld [vmem:[%s3142_s0 + $0x1c] sm:$0xf0]  ;;  %v2255_v41 = vld [vmem:[%s3142_s0 + $0xc] sm:$0xf]  ;;  %v1945_v42 = vld [vmem:[%s3142_s0 + $0x20] sm:$0xf0] }
   0xf   :  { %454 = vmatpush.bf16.msra.mxu1 %v2272_v13  ;;  %v2298_v44 = vld [vmem:[%s3140_s1 + $0x130] sm:$0xff]  ;;  %v1944_v46 = vor.u32 %v2258_v39, %v1943_v38  ;;  %v1948_v47 = vor.u32 %v2255_v41, %v1945_v42  ;;  %v2297_v48 = vld [vmem:[%s3140_s1 + $0x128] sm:$0xff]  ;;  %v2296_v50 = vld [vmem:[%s3140_s1 + $0x120] sm:$0xff] }
  0x10   :  { %468 = vmatpush.bf16.msra.mxu2 %v2280_v14  ;;  %v2306_v45 = vld [vmem:[%s3140_s1 + $0x170] sm:$0xff]  ;;  %v2305_v49 = vld [vmem:[%s3140_s1 + $0x168] sm:$0xff]  ;;  %v2304_v51 = vld [vmem:[%s3140_s1 + $0x160] sm:$0xff] }
  0x11   :  { %482 = vmatpush.bf16.msra.mxu3 %v2288_v15  ;;  %v2295_v52 = vld [vmem:[%s3140_s1 + $0x118] sm:$0xff]  ;;  %v2294_v54 = vld [vmem:[%s3140_s1 + $0x110] sm:$0xff]  ;;  %v2293_v56 = vld [vmem:[%s3140_s1 + $0x108] sm:$0xff] }
  0x12   :  { %441 = vmatpush.bf16.msra.mxu0 %v2263_v16  ;;  %v2303_v53 = vld [vmem:[%s3140_s1 + $0x158] sm:$0xff]  ;;  %v2302_v55 = vld [vmem:[%s3140_s1 + $0x150] sm:$0xff]  ;;  %v2301_v57 = vld [vmem:[%s3140_s1 + $0x148] sm:$0xff] }
  0x13   :  { %455 = vmatpush.bf16.msra.mxu1 %v2271_v17  ;;  %v2292_v58 = vld [vmem:[%s3140_s1 + $0x100] sm:$0xff]  ;;  %v1951_v60 = vld [vmem:[%s3142_s0 + $0x10] sm:$0xf]  ;;  %v2259_v61 = vld [vmem:[%s3142_s0 + $0x24] sm:$0xf0]  ;;  %v2381_v31 = vpop.eup %2380 }
  0x14   :  { %469 = vmatpush.bf16.msra.mxu2 %v2279_v18  ;;  %v2300_v59 = vld [vmem:[%s3140_s1 + $0x140] sm:$0xff]  ;;  %v2256_v62 = vld [vmem:[%s3142_s0 + $0x14] sm:$0xf]  ;;  %v1953_v63 = vld [vmem:[%s3142_s0 + $0x28] sm:$0xf0]  ;;  %v1952_v0 = vor.u32 %v2259_v61, %v1951_v60  ;;  %v530_v32 = vmul.f32 32.0, %v2381_v31  ;;  %vm534_vm1 = vweird.f32 %v2381_v31 }
  0x15   :  { %483 = vmatpush.bf16.msra.mxu3 %v2287_v19  ;;  %v1956_v1 = vor.u32 %v2256_v62, %v1953_v63  ;;  %v2701_v4 = vld [vmem:[%s3141_s2] sm:$0xff]  ;;  %v2707_v8 = vld [vmem:[%s3141_s2 + $0x8] sm:$0xff]  ;;  %v2721_v33 = vld [vmem:[%s3141_s2 + $0x12] ss:$0 sm:$0xff] }
  0x16   :  { %442 = vmatpush.bf16.msra.mxu0 %v2262_v20  ;;  %578 = vrot.lane.b32.xlu2 %v2721_v33, %s2483_s29 }
  0x17   :  { %456 = vmatpush.bf16.msra.mxu1 %v2270_v21 }
  0x18   :  { %470 = vmatpush.bf16.msra.mxu2 %v2278_v22 }
  0x19   :  { %484 = vmatpush.bf16.msra.mxu3 %v2286_v23 }
  0x1a   :  { %443 = vmatpush.bf16.msra.mxu0 %v2261_v24 }
  0x1b   :  { %457 = vmatpush.bf16.msra.mxu1 %v2269_v25 }
  0x1c   :  { %471 = vmatpush.bf16.msra.mxu2 %v2277_v26 }
  0x1d   :  { %485 = vmatpush.bf16.msra.mxu3 %v2285_v27 }
  0x1e   :  { %444 = vmatpush.bf16.msra.mxu0 %v2260_v28 }
  0x1f   :  { %458 = vmatpush.bf16.msra.mxu1 %v2268_v29 }
  0x20   :  { %472 = vmatpush.bf16.msra.mxu2 %v2276_v36 }
  0x21   :  { %486 = vmatpush.bf16.msra.mxu3 %v2284_v37  ;;  %445 = vmatmul.bf16.vlgmr.msra.gmra.mxu0 %v1936_v40 }
  0x22   :  { %493 = vmatpush.bf16.msrb.mxu0 %v2299_v34  ;;  %459 = vmatmul.bf16.vlgmr.msra.gmra.mxu1 %v1940_v43  ;;  %v531_v34 = vsub.f32 1.0, %v530_v32 }
  0x23   :  { %507 = vmatpush.bf16.msrb.mxu1 %v2307_v35  ;;  %473 = vmatmul.bf16.vlgmr.msra.gmra.mxu2 %v1944_v46 }
  0x24   :  { %487 = vmatmul.bf16.vlgmr.msra.gmra.mxu3 %v1948_v47  ;;  %v532_v35 = vmul.f32 %v2381_v31, %v531_v34 }
  0x26   :  { %494 = vmatpush.bf16.msrb.mxu0 %v2298_v44  ;;  %v533_v36 = vadd.f32 %v2381_v31, %v532_v35 }
  0x27   :  { %508 = vmatpush.bf16.msrb.mxu1 %v2306_v45 }
  0x28   :  { %v2725_v37 = vsel %vm534_vm1, %v2381_v31, %v533_v36 }
  0x2a   :  { %495 = vmatpush.bf16.msrb.mxu0 %v2297_v48  ;;  %v2736_v48 = vld [vmem:[%s3140_s1 + $0x188] sm:$0xff] }
  0x2b   :  { %509 = vmatpush.bf16.msrb.mxu1 %v2305_v49  ;;  %611 = vmatpush.bf16.msrb.mxu2 %v2736_v48 }
  0x2e   :  { %496 = vmatpush.bf16.msrb.mxu0 %v2296_v50 }
  0x2f   :  { %510 = vmatpush.bf16.msrb.mxu1 %v2304_v51  ;;  %v2743_v51 = vld [vmem:[%s3140_s1 + $0x180] sm:$0xff] }
  0x30   :  { %612 = vmatpush.bf16.msrb.mxu2 %v2743_v51 }
  0x32   :  { %497 = vmatpush.bf16.msrb.mxu0 %v2295_v52 }
  0x33   :  { %511 = vmatpush.bf16.msrb.mxu1 %v2303_v53 }
  0x36   :  { %498 = vmatpush.bf16.msrb.mxu0 %v2294_v54 }
  0x37   :  { %512 = vmatpush.bf16.msrb.mxu1 %v2302_v55 }
  0x3a   :  { %499 = vmatpush.bf16.msrb.mxu0 %v2293_v56 }
  0x3b   :  { %513 = vmatpush.bf16.msrb.mxu1 %v2301_v57 }
  0x3e   :  { %500 = vmatpush.bf16.msrb.mxu0 %v2292_v58 }
  0x3f   :  { %514 = vmatpush.bf16.msrb.mxu1 %v2300_v59 }
  0x41   :  { %501 = vmatmul.bf16.vlgmr.msrb.gmra.mxu0 %v1952_v0 }
  0x42   :  { %515 = vmatmul.bf16.vlgmr.msrb.gmra.mxu1 %v1956_v1 }
  0x9e   :  { %v446_v2 = vpop.f32.mrf.mxu0 }
  0x9f   :  { %v460_v3 = vpop.f32.mrf.mxu1  ;;  %v447_v5 = vadd.f32 %v446_v2, %v2701_v4 }
  0xa1   :  { %v461_v7 = vadd.f32 %v460_v3, %v447_v5 }
  0xa6   :  { %v474_v6 = vpop.f32.mrf.mxu2  ;;  %v448_v9 = vpop.f32.mrf.mxu0 }
  0xa7   :  { %v462_v10 = vpop.f32.mrf.mxu1  ;;  %v488_v11 = vpop.f32.mrf.mxu3  ;;  %v475_v12 = vadd.f32 %v474_v6, %v461_v7  ;;  %v449_v13 = vadd.f32 %v448_v9, %v2707_v8 }
  0xa9   :  { %v489_v14 = vadd.f32 %v488_v11, %v475_v12  ;;  %v463_v15 = vadd.f32 %v462_v10, %v449_v13  ;;  %v579_v11 = vpop.permute.xlu2 %578 }
  0xae   :  { %v476_v16 = vpop.f32.mrf.mxu2 }
  0xaf   :  { %v477_v20 = vadd.f32 %v476_v16, %v463_v15  ;;  %v490_v22 = vpop.f32.mrf.mxu3 }
  0xb1   :  { %v491_v24 = vadd.f32 %v490_v22, %v477_v20 }
  0xbe   :  { %v502_v17 = vpop.f32.mrf.mxu0 }
  0xbf   :  { %v516_v18 = vpop.f32.mrf.mxu1  ;;  %v503_v19 = vadd.f32 %v502_v17, %v489_v14  ;;  %v2753_v17 = vld [vmem:[%s3141_s2 + $0x13] ss:$0 sm:$0xff] }
  0xc1   :  { %v2710_v21 = vadd.f32 %v516_v18, %v503_v19 }
  0xc3   :  { %v523_v23 = vsel %vm522_vm0, %v2710_v21, 0.0 }
  0xc4   :  { %524 = vadd.xlane.f32.xlu0 %v523_v23 }
  0xc6   :  { %v504_v25 = vpop.f32.mrf.mxu0 }
  0xc7   :  { %v505_v26 = vadd.f32 %v504_v25, %v491_v24  ;;  %v518_v27 = vpop.f32.mrf.mxu1 }
  0xc9   :  { %v2714_v28 = vadd.f32 %v518_v27, %v505_v26 }
  0xcb   :  { %v526_v29 = vsel %vm522_vm0, %v2714_v28, 0.0 }
  0xcc   :  { %527 = vadd.xlane.f32.xlu0 %v526_v29 }
 0x137   :  { %v525_v38 = vpop.xlane.xlu0 %524 }
 0x138   :  { %v536_v39 = vmul.f32 %v2725_v37, %v525_v38 }
 0x13a   :  { %v538_v40 = vsub.f32 %v2710_v21, %v536_v39 }
 0x13c   :  { %v540_v41 = vmul.f32 %v538_v40, %v538_v40 }
 0x13e   :  { %v542_v42 = vsel %vm522_vm0, %v540_v41, 0.0 }
 0x13f   :  { %543 = vadd.xlane.f32.xlu1 %v542_v42  ;;  %v528_v43 = vpop.xlane.xlu0 %527 }
 0x140   :  { %v537_v44 = vmul.f32 %v2725_v37, %v528_v43 }
 0x142   :  { %v539_v45 = vsub.f32 %v2714_v28, %v537_v44 }
 0x144   :  { %v541_v46 = vmul.f32 %v539_v45, %v539_v45 }
 0x146   :  { %v545_v47 = vsel %vm522_vm0, %v541_v46, 0.0 }
 0x147   :  { %546 = vadd.xlane.f32.xlu1 %v545_v47 }
 0x1b2   :  { %v544_v49 = vpop.xlane.xlu1 %543 }
 0x1b3   :  { %v548_v50 = vmul.f32 %v544_v49, %v2725_v37 }
 0x1b5   :  { %v550_v52 = vadd.f32 1e-12, %v548_v50 }
 0x1b7   :  { %2382 = vrsqrt.f32 %v550_v52  ;;  %vm558_vm3 = vweird.f32 %v550_v52 }
 0x1ba   :  { %v547_v53 = vpop.xlane.xlu1 %546 }
 0x1bb   :  { %v549_v54 = vmul.f32 %v547_v53, %v2725_v37 }
 0x1bd   :  { %v2383_v55 = vpop.eup %2382  ;;  %v551_v56 = vadd.f32 1e-12, %v549_v54 }
 0x1be   :  { %v553_v57 = vmul.f32 %v2383_v55, %v550_v52  ;;  %vm559_vm2 = vweird.f32 %v2383_v55 }
 0x1bf   :  { %2384 = vrsqrt.f32 %v551_v56  ;;  %vm560_vm4 = vmor %vm558_vm3, %vm559_vm2  ;;  %vm568_vm6 = vweird.f32 %v551_v56 }
 0x1c0   :  { %v554_v58 = vmul.f32 %v2383_v55, %v553_v57 }
 0x1c2   :  { %v555_v59 = vmul.f32 0.5, %v554_v58 }
 0x1c4   :  { %v556_v60 = vsub.f32 1.5, %v555_v59 }
 0x1c5   :  { %v2385_v61 = vpop.eup %2384 }
 0x1c6   :  { %v557_v62 = vmul.f32 %v2383_v55, %v556_v60  ;;  %v563_v63 = vmul.f32 %v2385_v61, %v551_v56  ;;  %vm569_vm5 = vweird.f32 %v2385_v61 }
 0x1c7   :  { %vm570_vm7 = vmor %vm568_vm6, %vm569_vm5 }
 0x1c8   :  { %v564_v0 = vmul.f32 %v2385_v61, %v563_v63  ;;  %v561_v2 = vsel %vm560_vm4, %v2383_v55, %v557_v62 }
 0x1c9   :  { %v572_v5 = vmul.f32 %v561_v2, %v538_v40 }
 0x1ca   :  { %v565_v1 = vmul.f32 0.5, %v564_v0 }
 0x1cb   :  { %v575_v10 = vmul.f32 %v2721_v33, %v572_v5 }
 0x1cc   :  { %v566_v3 = vsub.f32 1.5, %v565_v1 }
 0x1cd   :  { %v581_v13 = vadd.f32 %v579_v11, %v575_v10 }
 0x1ce   :  { %v567_v6 = vmul.f32 %v2385_v61, %v566_v3 }
 0x1d0   :  { %v571_v7 = vsel %vm570_vm7, %v2385_v61, %v567_v6 }
 0x1d1   :  { %v573_v9 = vmul.f32 %v571_v7, %v539_v45 }
 0x1d3   :  { %v576_v12 = vmul.f32 %v2721_v33, %v573_v9 }
 0x1d5   :  { %v582_v14 = vadd.f32 %v579_v11, %v576_v12 }
 0x1d7   :  { %v583_v15 = vpack.c.bf16 %v582_v14, %v581_v13 }
 0x1d9   :  { %2157 = vmatmul.msk.bf16.vlgmr.msrb.gmra.mxu2 %vm522_vm0, %v583_v15 }
 0x25c   :  { %v614_v16 = vpop.f32.mrf.mxu2 }
 0x25d   :  { %v615_v19 = vadd.f32 %v2753_v17, %v614_v16 }
 0x264   :  { %v616_v18 = vpop.f32.mrf.mxu2 }
 0x265   :  { %v617_v20 = vadd.f32 %v2753_v17, %v616_v18 }
 0x267   :  { %v2757_v22 = vpack.c.bf16 %v617_v20, %v615_v19 }
 0x269   :  { %696 = vrot.lane.b32.xlu1 %v2757_v22, %s2484_s9  ;;  %698 = vrot.lane.b32.xlu0 %v2757_v22, %s2485_s10 }
 0x26a   :  { %621 = vrot.lane.b32.xlu2 %v2757_v22, %s2483_s29 }
 0x271   :  { %830 = vrot.lane.b32.xlu0 %v2757_v22, %s2486_s11  ;;  %627 = vrot.lane.b32.xlu1 %v2707_v8, %s2487_s12 }
 0x272   :  { %765 = vrot.lane.b32.xlu2 %v2757_v22, %s2488_s13 }
 0x27a   :  { %832 = vrot.lane.b32.xlu2 %v2757_v22, %s2489_s14 }
 0x282   :  { %763 = vrot.lane.b32.xlu2 %v2757_v22, %s2490_s15 }
 0x28a   :  { %625 = vrot.lane.b32.xlu2 %v2701_v4, %s2487_s12 }
 0x2c4   :  { %v622_v23 = vpop.permute.xlu2 %621 }
 0x2c5   :  { %v636_v24 = vsel %vm631_vm8, %v622_v23, 0 }
 0x2c6   :  { %645 = vmatpush.bf16.xpose.msrb.mxu3 %v636_v24 }
 0x2cc   :  { %v766_v8 = vpop.permute.xlu2 %765 }
 0x2cd   :  { %v771_v25 = vsel %vm631_vm8, %v766_v8, 0  ;;  %2158 = vmatmul.msk.bf16.vlgmr.msrb.gmra.mxu3 %vm631_vm8, %v2757_v22 }
 0x2ce   :  { %780 = vmatpush.bf16.xpose.msra.mxu1 %v771_v25 }
 0x2d4   :  { %v833_v26 = vpop.permute.xlu2 %832 }
 0x2d5   :  { %v838_v31 = vsel %vm631_vm8, %v833_v26, 0 }
 0x2db   :  { %v699_v27 = vpop.permute.xlu0 %698  ;;  %v697_v4 = vpop.permute.xlu1 %696 }
 0x2dc   :  { %v704_v29 = vsel %vm631_vm8, %v699_v27, 0  ;;  %v764_v30 = vpop.permute.xlu2 %763 }
 0x2dd   :  { %2162 = vmatmul.msk.bf16.vlgmr.msra.gmra.mxu1 %vm631_vm8, %v764_v30  ;;  %713 = vmatpush.bf16.xpose.msra.mxu3 %v704_v29 }
 0x2e3   :  { %v831_v32 = vpop.permute.xlu0 %830  ;;  %v2792_v42 = vpop.permute.xlu1 %627 }
 0x2e4   :  { %2160 = vmatmul.msk.bf16.vlgmr.msra.gmra.mxu3 %vm631_vm8, %v697_v4  ;;  %v2786_v34 = vpop.permute.xlu2 %625 }
 0x2e5   :  { %847 = vmatpush.bf16.xpose.msrb.mxu3 %v838_v31 }
 0x2f4   :  { %2164 = vmatmul.msk.bf16.vlgmr.msrb.gmra.mxu3 %vm631_vm8, %v831_v32 }
 0x350   :  { %v647_v35 = vpop.f32.mrf.mxu3 }
 0x351   :  { %v648_v36 = vadd.f32 %v647_v35, %v2786_v34 }
 0x353   :  { %v653_v38 = vsel %vm652_vm9, %v648_v36, -inf }
 0x354   :  { %654 = vmax.xlane.f32.xlu0 %v653_v38 }
 0x358   :  { %v649_v43 = vpop.f32.mrf.mxu3 }
 0x359   :  { %v650_v44 = vadd.f32 %v649_v43, %v2792_v42 }
 0x35a   :  { %v782_v39 = vpop.f32.mrf.mxu1 }
 0x35b   :  { %v783_v40 = vadd.f32 %v782_v39, %v2786_v34  ;;  %v656_v49 = vsel %vm652_vm9, %v650_v44, -inf }
 0x35d   :  { %v787_v41 = vsel %vm652_vm9, %v783_v40, -inf }
 0x35e   :  { %788 = vmax.xlane.f32.xlu2 %v787_v41 }
 0x362   :  { %v784_v45 = vpop.f32.mrf.mxu1 }
 0x363   :  { %v785_v46 = vadd.f32 %v784_v45, %v2792_v42 }
 0x365   :  { %v790_v47 = vsel %vm652_vm9, %v785_v46, -inf }
 0x366   :  { %791 = vmax.xlane.f32.xlu1 %v790_v47  ;;  %657 = vmax.xlane.f32.xlu2 %v656_v49 }
 0x367   :  { %v715_v50 = vpop.f32.mrf.mxu3 }
 0x368   :  { %v716_v52 = vadd.f32 %v715_v50, %v2786_v34 }
 0x36a   :  { %v720_v53 = vsel %vm652_vm9, %v716_v52, -inf }
 0x36e   :  { %721 = vmax.xlane.f32.xlu1 %v720_v53 }
 0x36f   :  { %v717_v54 = vpop.f32.mrf.mxu3 }
 0x370   :  { %v718_v55 = vadd.f32 %v717_v54, %v2792_v42 }
 0x372   :  { %v723_v56 = vsel %vm652_vm9, %v718_v55, -inf }
 0x373   :  { %724 = vmax.xlane.f32.xlu0 %v723_v56 }
 0x377   :  { %v849_v57 = vpop.f32.mrf.mxu3 }
 0x378   :  { %v2803_v58 = vadd.f32 %v849_v57, %v2786_v34 }
 0x37a   :  { %v854_v59 = vsel %vm652_vm9, %v2803_v58, -inf }
 0x37b   :  { %855 = vmax.xlane.f32.xlu0 %v854_v59 }
 0x37f   :  { %v851_v60 = vpop.f32.mrf.mxu3 }
 0x380   :  { %v852_v61 = vadd.f32 %v851_v60, %v2792_v42 }
 0x382   :  { %v857_v62 = vsel %vm652_vm9, %v852_v61, -inf }
 0x383   :  { %858 = vmax.xlane.f32.xlu2 %v857_v62 }
 0x39b   :  { %743 = vrot.lane.b32.xlu2 %v2757_v22, %s2491_s16 }
 0x3c7   :  { %v655_v63 = vpop.xlane.xlu0 %654 }
 0x3c8   :  { %v659_v0 = vsub.f32 %v648_v36, %v655_v63 }
 0x3ca   :  { %v661_v1 = vmul.f32 1.442695, %v659_v0 }
 0x3cc   :  { %2386 = vpow2.f32 %v661_v1 }
 0x3d1   :  { %v789_v2 = vpop.xlane.xlu2 %788 }
 0x3d2   :  { %v2811_v3 = vpop.eup %2386  ;;  %v793_v5 = vsub.f32 %v783_v40, %v789_v2 }
 0x3d3   :  { %v665_v6 = vsel %vm652_vm9, %v2811_v3, 0.0 }
 0x3d4   :  { %v795_v7 = vmul.f32 1.442695, %v793_v5  ;;  %666 = vadd.xlane.f32.xlu1 %v665_v6 }
 0x3d6   :  { %2388 = vpow2.f32 %v795_v7 }
 0x3d9   :  { %v792_v9 = vpop.xlane.xlu1 %791  ;;  %v658_v10 = vpop.xlane.xlu2 %657 }
 0x3da   :  { %v794_v11 = vsub.f32 %v785_v46, %v792_v9  ;;  %v660_v12 = vsub.f32 %v650_v44, %v658_v10 }
 0x3dc   :  { %v2815_v13 = vpop.eup %2388  ;;  %v797_v14 = vmul.f32 1.442695, %v794_v11  ;;  %v663_v15 = vmul.f32 1.442695, %v660_v12 }
 0x3dd   :  { %v799_v16 = vsel %vm652_vm9, %v2815_v13, 0.0 }
 0x3de   :  { %2390 = vpow2.f32 %v797_v14  ;;  %800 = vadd.xlane.f32.xlu1 %v799_v16 }
 0x3df   :  { %2392 = vpow2.f32 %v663_v15 }
 0x3e1   :  { %v722_v18 = vpop.xlane.xlu1 %721 }
 0x3e2   :  { %v726_v19 = vsub.f32 %v716_v52, %v722_v18 }
 0x3e4   :  { %v2819_v20 = vpop.eup %2390  ;;  %v728_v23 = vmul.f32 1.442695, %v726_v19 }
 0x3e5   :  { %v2393_v24 = vpop.eup %2392  ;;  %v802_v8 = vsel %vm652_vm9, %v2819_v20, 0.0 }
 0x3e6   :  { %2394 = vpow2.f32 %v728_v23  ;;  %v668_v25 = vsel %vm652_vm9, %v2393_v24, 0.0  ;;  %803 = vadd.xlane.f32.xlu1 %v802_v8  ;;  %v725_v26 = vpop.xlane.xlu0 %724 }
 0x3e7   :  { %669 = vadd.xlane.f32.xlu0 %v668_v25  ;;  %v727_v27 = vsub.f32 %v718_v55, %v725_v26 }
 0x3e9   :  { %v730_v29 = vmul.f32 1.442695, %v727_v27 }
 0x3eb   :  { %2396 = vpow2.f32 %v730_v29 }
 0x3ec   :  { %v2395_v30 = vpop.eup %2394 }
 0x3ed   :  { %v732_v31 = vsel %vm652_vm9, %v2395_v30, 0.0 }
 0x3ee   :  { %733 = vadd.xlane.f32.xlu2 %v732_v31  ;;  %v856_v43 = vpop.xlane.xlu0 %855 }
 0x3ef   :  { %v860_v44 = vsub.f32 %v2803_v58, %v856_v43 }
 0x3f1   :  { %v2397_v4 = vpop.eup %2396  ;;  %v862_v45 = vmul.f32 1.442695, %v860_v44 }
 0x3f2   :  { %v735_v32 = vsel %vm652_vm9, %v2397_v4, 0.0 }
 0x3f3   :  { %736 = vadd.xlane.f32.xlu1 %v735_v32 }
 0x3f6   :  { %v859_v35 = vpop.xlane.xlu2 %858 }
 0x3f7   :  { %v861_v36 = vsub.f32 %v852_v61, %v859_v35 }
 0x3f9   :  { %v864_v38 = vmul.f32 1.442695, %v861_v36 }
 0x3fb   :  { %2398 = vpow2.f32 %v864_v38  ;;  %676 = vrot.lane.b32.xlu0 %v2757_v22, %s2487_s12 }
 0x3fc   :  { %2400 = vpow2.f32 %v862_v45 }
 0x3fe   :  { %v744_v39 = vpop.permute.xlu2 %743 }
 0x3ff   :  { %756 = vmatpush.bf16.msra.mxu0 %v744_v39 }
 0x401   :  { %v2399_v40 = vpop.eup %2398 }
 0x402   :  { %v869_v41 = vsel %vm652_vm9, %v2399_v40, 0.0  ;;  %v2401_v46 = vpop.eup %2400 }
 0x403   :  { %870 = vadd.xlane.f32.xlu1 %v869_v41  ;;  %v866_v47 = vsel %vm652_vm9, %v2401_v46, 0.0 }
 0x406   :  { %810 = vrot.lane.b32.xlu2 %v2757_v22, %s2492_s17 }
 0x40e   :  { %931 = vrot.lane.b32.xlu2 %v2736_v48, %s2494_s19 }
 0x41c   :  { %877 = vrot.lane.b32.xlu1 %v2757_v22, %s2493_s18 }
 0x425   :  { %867 = vadd.xlane.f32.xlu0 %v866_v47 }
 0x439   :  { %955 = vrot.lane.b32.xlu0 %v2753_v17, %s2494_s19 }
 0x447   :  { %v667_v49 = vpop.xlane.xlu1 %666 }
 0x451   :  { %v801_v50 = vpop.xlane.xlu1 %800 }
 0x459   :  { %v804_v52 = vpop.xlane.xlu1 %803 }
 0x45a   :  { %v670_v53 = vpop.xlane.xlu0 %669 }
 0x45b   :  { %2402 = vrcp.f32 %v670_v53 }
 0x45c   :  { %2404 = vrcp.f32 %v667_v49 }
 0x461   :  { %v734_v54 = vpop.xlane.xlu2 %733  ;;  %v2403_v56 = vpop.eup %2402 }
 0x462   :  { %2406 = vrcp.f32 %v734_v54  ;;  %v2405_v57 = vpop.eup %2404  ;;  %v674_v59 = vmul.f32 %v2403_v56, %v2393_v24 }
 0x463   :  { %v673_v22 = vmul.f32 %v2405_v57, %v2811_v3 }
 0x465   :  { %v675_v1 = vpack.c.bf16 %v674_v59, %v673_v22 }
 0x466   :  { %v737_v55 = vpop.xlane.xlu1 %736 }
 0x467   :  { %2408 = vrcp.f32 %v737_v55 }
 0x468   :  { %v2407_v58 = vpop.eup %2406  ;;  %2410 = vrcp.f32 %v804_v52 }
 0x469   :  { %v740_v62 = vmul.f32 %v2407_v58, %v2395_v30  ;;  %v811_v0 = vpop.permute.xlu2 %810  ;;  %2412 = vrcp.f32 %v801_v50 }
 0x46d   :  { %v2409_v60 = vpop.eup %2408  ;;  %v677_v61 = vpop.permute.xlu0 %676 }
 0x46e   :  { %v741_v63 = vmul.f32 %v2409_v60, %v2397_v4  ;;  %689 = vmatpush.bf16.msra.mxu2 %v677_v61  ;;  %v2411_v3 = vpop.eup %2410 }
 0x46f   :  { %v2413_v5 = vpop.eup %2412  ;;  %v808_v6 = vmul.f32 %v2411_v3, %v2819_v20 }
 0x470   :  { %v742_v2 = vpack.c.bf16 %v741_v63, %v740_v62  ;;  %v807_v7 = vmul.f32 %v2413_v5, %v2815_v13  ;;  %v2311_v5 = vld [vmem:[%s3140_s1 + $0x198] sm:$0xff] }
 0x471   :  { %2159 = vmatmul.msk.bf16.vlgmr.msra.gmra.mxu2 %vm652_vm9, %v675_v1  ;;  %v932_v25 = vpop.permute.xlu2 %931 }
 0x472   :  { %823 = vmatpush.bf16.msrb.mxu2 %v811_v0  ;;  %2161 = vmatmul.msk.bf16.vlgmr.msra.gmra.mxu0 %vm652_vm9, %v742_v2  ;;  %v809_v9 = vpack.c.bf16 %v808_v6, %v807_v7 }
 0x473   :  { %944 = vmatpush.bf16.msrb.mxu1 %v932_v25 }
 0x476   :  { %v871_v10 = vpop.xlane.xlu1 %870  ;;  %1042 = vmatpush.bf16.msra.mxu2 %v2311_v5 }
 0x477   :  { %2414 = vrcp.f32 %v871_v10 }
 0x47d   :  { %v2415_v11 = vpop.eup %2414 }
 0x47e   :  { %v875_v14 = vmul.f32 %v2415_v11, %v2399_v40 }
 0x481   :  { %2163 = vmatmul.msk.bf16.vlgmr.msrb.gmra.mxu2 %vm652_vm9, %v809_v9  ;;  %v2310_v9 = vld [vmem:[%s3140_s1 + $0x190] sm:$0xff] }
 0x482   :  { %1043 = vmatpush.bf16.msra.mxu2 %v2310_v9 }
 0x48e   :  { %v878_v48 = vpop.permute.xlu1 %877 }
 0x48f   :  { %890 = vmatpush.bf16.msrb.mxu0 %v878_v48  ;;  %v2374_v48 = vld [vmem:[%s3141_s2 + $0x14] ss:$0 sm:$0xff] }
 0x498   :  { %v868_v17 = vpop.xlane.xlu0 %867 }
 0x499   :  { %2416 = vrcp.f32 %v868_v17 }
 0x49f   :  { %v2417_v12 = vpop.eup %2416 }
 0x4a0   :  { %v874_v15 = vmul.f32 %v2417_v12, %v2401_v46 }
 0x4a2   :  { %v876_v16 = vpack.c.bf16 %v875_v14, %v874_v15 }
 0x4a4   :  { %2165 = vmatmul.msk.bf16.vlgmr.msrb.gmra.mxu0 %vm652_vm9, %v876_v16 }
 0x4ab   :  { %v956_v53 = vpop.permute.xlu0 %955 }
 0x4ef   :  { %v758_v18 = vpop.f32.mrf.mxu0 }
 0x4f4   :  { %v691_v19 = vpop.f32.mrf.mxu2 }
 0x4f7   :  { %v760_v20 = vpop.f32.mrf.mxu0 }
 0x4f8   :  { %v2342_v13 = vpack.i.bf16 %v760_v20, %v758_v18 }
 0x4fa   :  { %2343 = vrot.lane.b32.xlu2 %v2342_v13, %s2495_s20 }
 0x4fc   :  { %v693_v23 = vpop.f32.mrf.mxu2 }
 0x504   :  { %v825_v24 = vpop.f32.mrf.mxu2 }
 0x50c   :  { %v827_v8 = vpop.f32.mrf.mxu2 }
 0x50d   :  { %v2347_v26 = vpack.i.bf16 %v827_v8, %v825_v24 }
 0x50f   :  { %2348 = vrot.lane.b32.xlu2 %v2347_v26, %s2496_s21 }
 0x517   :  { %929 = vrot.lane.b32.xlu2 %v2743_v51, %s2494_s19 }
 0x521   :  { %v892_v27 = vpop.f32.mrf.mxu0 }
 0x529   :  { %v894_v29 = vpop.f32.mrf.mxu0 }
 0x52a   :  { %v2352_v30 = vpack.i.bf16 %v894_v29, %v892_v27 }
 0x52c   :  { %2353 = vrot.lane.b32.xlu1 %v2352_v30, %s2497_s22 }
 0x554   :  { %v2344_v31 = vpop.permute.xlu2 %2343 }
 0x555   :  { %v2346_v35 = vunpack.i.h.bf16 %v2344_v31  ;;  %v2345_v36 = vunpack.i.l.bf16 %v2344_v31 }
 0x557   :  { %v921_v41 = vsel %vm631_vm8, %v691_v19, %v2345_v36  ;;  %v922_v51 = vsel %vm631_vm8, %v693_v23, %v2346_v35 }
 0x569   :  { %v2349_v4 = vpop.permute.xlu2 %2348 }
 0x56a   :  { %v2351_v38 = vunpack.i.h.bf16 %v2349_v4  ;;  %v2350_v39 = vunpack.i.l.bf16 %v2349_v4 }
 0x56c   :  { %v924_v45 = vsel %vm652_vm9, %v922_v51, %v2351_v38  ;;  %v923_v46 = vsel %vm652_vm9, %v921_v41, %v2350_v39 }
 0x571   :  { %v930_v32 = vpop.permute.xlu2 %929 }
 0x572   :  { %945 = vmatpush.bf16.msrb.mxu1 %v930_v32 }
 0x59e   :  { %v2354_v40 = vpop.permute.xlu1 %2353 }
 0x59f   :  { %v2356_v43 = vunpack.i.h.bf16 %v2354_v40  ;;  %v2355_v44 = vunpack.i.l.bf16 %v2354_v40 }
 0x5a1   :  { %v927_v47 = vsel %vm925_vm10, %v924_v45, %v2356_v43  ;;  %v926_v49 = vsel %vm925_vm10, %v923_v46, %v2355_v44 }
 0x5a2   :  { %v928_v50 = vpack.c.bf16 %v927_v47, %v926_v49 }
 0x5a4   :  { %2166 = vmatmul.msk.bf16.vlgmr.msrb.gmra.mxu1 %vm522_vm0, %v928_v50 }
 0x621   :  { %v947_v52 = vpop.f32.mrf.mxu1 }
 0x622   :  { %v952_v54 = vadd.f32 %v947_v52, %v2710_v21 }
 0x624   :  { %v2859_v55 = vadd.f32 %v956_v53, %v952_v54 }
 0x626   :  { %v960_v56 = vsel %vm522_vm0, %v2859_v55, 0.0 }
 0x627   :  { %961 = vadd.xlane.f32.xlu1 %v960_v56 }
 0x629   :  { %v949_v57 = vpop.f32.mrf.mxu1 }
 0x62a   :  { %v953_v58 = vadd.f32 %v949_v57, %v2714_v28 }
 0x62c   :  { %v2864_v59 = vadd.f32 %v956_v53, %v953_v58  ;;  %v2315_v58 = vld [vmem:[%s3140_s1 + $0x1b8] sm:$0xff] }
 0x62d   :  { %1171 = vmatpush.bf16.msra.mxu3 %v2315_v58 }
 0x62e   :  { %v963_v60 = vsel %vm522_vm0, %v2864_v59, 0.0 }
 0x62f   :  { %964 = vadd.xlane.f32.xlu2 %v963_v60 }
 0x647   :  { %1004 = vrot.lane.b32.xlu2 %v2721_v33, %s2487_s12 }
 0x69a   :  { %v962_v22 = vpop.xlane.xlu1 %961 }
 0x69b   :  { %v966_v21 = vmul.f32 %v962_v22, %v2725_v37 }
 0x69d   :  { %v968_v61 = vsub.f32 %v2859_v55, %v966_v21 }
 0x69f   :  { %v970_v62 = vmul.f32 %v968_v61, %v968_v61 }
 0x6a1   :  { %v972_v63 = vsel %vm522_vm0, %v970_v62, 0.0  ;;  %v2314_v62 = vld [vmem:[%s3140_s1 + $0x1b0] sm:$0xff] }
 0x6a2   :  { %v965_v0 = vpop.xlane.xlu2 %964  ;;  %973 = vadd.xlane.f32.xlu0 %v972_v63  ;;  %1172 = vmatpush.bf16.msra.mxu3 %v2314_v62 }
 0x6a3   :  { %v967_v28 = vmul.f32 %v965_v0, %v2725_v37 }
 0x6a5   :  { %v969_v1 = vsub.f32 %v2864_v59, %v967_v28 }
 0x6a7   :  { %v971_v2 = vmul.f32 %v969_v1, %v969_v1 }
 0x6a9   :  { %v975_v3 = vsel %vm522_vm0, %v971_v2, 0.0 }
 0x6aa   :  { %976 = vadd.xlane.f32.xlu1 %v975_v3  ;;  %v1005_v29 = vpop.permute.xlu2 %1004 }
 0x6b6   :  { %1184 = vrot.lane.b32.xlu0 %v2374_v48, %s2487_s12 }
 0x6c3   :  { %1009 = vrot.lane.b32.xlu1 %v2721_v33, %s2494_s19 }
 0x715   :  { %v974_v6 = vpop.xlane.xlu0 %973 }
 0x716   :  { %v978_v7 = vmul.f32 %v974_v6, %v2725_v37  ;;  %v2313_v6 = vld [vmem:[%s3140_s1 + $0x1a8] sm:$0xff] }
 0x717   :  { %1173 = vmatpush.bf16.msra.mxu3 %v2313_v6 }
 0x718   :  { %v980_v10 = vadd.f32 1e-12, %v978_v7 }
 0x71a   :  { %2418 = vrsqrt.f32 %v980_v10  ;;  %vm988_vm12 = vweird.f32 %v980_v10 }
 0x71d   :  { %v977_v33 = vpop.xlane.xlu1 %976 }
 0x71e   :  { %v979_v17 = vmul.f32 %v977_v33, %v2725_v37 }
 0x720   :  { %v2419_v11 = vpop.eup %2418  ;;  %v981_v12 = vadd.f32 1e-12, %v979_v17 }
 0x721   :  { %v983_v14 = vmul.f32 %v2419_v11, %v980_v10  ;;  %vm989_vm11 = vweird.f32 %v2419_v11 }
 0x722   :  { %2420 = vrsqrt.f32 %v981_v12  ;;  %vm990_vm13 = vmor %vm988_vm12, %vm989_vm11  ;;  %vm998_vm15 = vweird.f32 %v981_v12 }
 0x723   :  { %v984_v15 = vmul.f32 %v2419_v11, %v983_v14 }
 0x725   :  { %v985_v16 = vmul.f32 0.5, %v984_v15 }
 0x727   :  { %v986_v18 = vsub.f32 1.5, %v985_v16 }
 0x728   :  { %v2421_v19 = vpop.eup %2420 }
 0x729   :  { %v993_v20 = vmul.f32 %v2421_v19, %v981_v12  ;;  %v987_v23 = vmul.f32 %v2419_v11, %v986_v18  ;;  %vm999_vm14 = vweird.f32 %v2421_v19  ;;  %v2312_v12 = vld [vmem:[%s3140_s1 + $0x1a0] sm:$0xff] }
 0x72a   :  { %vm1000_vm1 = vmor %vm998_vm15, %vm999_vm14  ;;  %1174 = vmatpush.bf16.msra.mxu3 %v2312_v12  ;;  %vm1163_vm15 = vcmask 523264   ;;  %v2946_v12 = vld [vmem:[%s3140_s1 + $0x1c8] sm:$0xff] }
 0x72b   :  { %v994_v13 = vmul.f32 %v2421_v19, %v993_v20  ;;  %v991_v25 = vsel %vm990_vm13, %v2419_v11, %v987_v23  ;;  %1271 = vmatpush.bf16.msra.mxu0 %v2946_v12 }
 0x72c   :  { %v1002_v27 = vmul.f32 %v991_v25, %v968_v61 }
 0x72d   :  { %v995_v24 = vmul.f32 0.5, %v994_v13 }
 0x72e   :  { %v1007_v32 = vmul.f32 %v1005_v29, %v1002_v27 }
 0x72f   :  { %v996_v8 = vsub.f32 1.5, %v995_v24 }
 0x731   :  { %v997_v26 = vmul.f32 %v2421_v19, %v996_v8 }
 0x733   :  { %v1001_v30 = vsel %vm1000_vm1, %v2421_v19, %v997_v26 }
 0x734   :  { %v1003_v31 = vmul.f32 %v1001_v30, %v969_v1 }
 0x735   :  { %v1010_v4 = vpop.permute.xlu1 %1009 }
 0x736   :  { %v1008_v35 = vmul.f32 %v1005_v29, %v1003_v31  ;;  %v1012_v36 = vadd.f32 %v1010_v4, %v1007_v32 }
 0x738   :  { %v1013_v38 = vadd.f32 %v1010_v4, %v1008_v35 }
 0x73a   :  { %v1014_v39 = vpack.c.bf16 %v1013_v38, %v1012_v36 }
 0x73c   :  { %2175 = vmatmul.msk.bf16.vlgmr.msra.gmra.mxu2 %vm522_vm0, %v1014_v39 }
 0x7bf   :  { %v1045_v40 = vpop.f32.mrf.mxu2 }
 0x7c0   :  { %v2891_v41 = vadd.f32 %v2374_v48, %v1045_v40 }
 0x7c2   :  { %v2894_v51 = vmul.f32 0.70710677, %v2891_v41 }
 0x7c4   :  { %v1054_v43 = vand.u32 2147483647, %v2894_v51  ;;  %vm1120_vm13 = vcmp.lt.f32.partialorder %v2894_v51, 0.0  ;;  %v1185_v51 = vpop.permute.xlu0 %1184 }
 0x7c6   :  { %v1056_v44 = vmul.f32 0.3275911, %v1054_v43  ;;  %v1108_v2 = vsub.f32 0.0, %v1054_v43 }
 0x7c7   :  { %v1047_v45 = vpop.f32.mrf.mxu2 }
 0x7c8   :  { %v1058_v46 = vadd.f32 1.0, %v1056_v44  ;;  %v2897_v47 = vadd.f32 %v2374_v48, %v1047_v45  ;;  %v1110_v48 = vmul.f32 %v1108_v2, %v1054_v43 }
 0x7ca   :  { %2422 = vrcp.f32 %v1058_v46  ;;  %v2900_v49 = vmul.f32 0.70710677, %v2897_v47  ;;  %v1071_v60 = vand.u32 2147483648, %v1058_v46  ;;  %v1069_v21 = vand.u32 2147483647, %v1058_v46 }
 0x7cb   :  { %vm1065_vm3 = vweird.f32 %v1058_v46  ;;  %v1112_v18 = vmul.f32 1.442695, %v1110_v48 }
 0x7cc   :  { %v1055_v50 = vand.u32 2147483647, %v2900_v49  ;;  %v1072_v63 = vor.u32 1.1754944e-38, %v1071_v60  ;;  %vm1070_vm5 = vcmp.eq.f32.partialorder %v1069_v21, 8.507059e+37  ;;  %vm1121_vm14 = vcmp.lt.f32.partialorder %v2900_v49, 0.0 }
 0x7cd   :  { %v1050_v60 = vmul.f32 0.5, %v2891_v41 }
 0x7ce   :  { %v1057_v52 = vmul.f32 0.3275911, %v1055_v50  ;;  %v1109_v23 = vsub.f32 0.0, %v1055_v50 }
 0x7d0   :  { %v2423_v53 = vpop.eup %2422  ;;  %v1059_v56 = vadd.f32 1.0, %v1057_v52  ;;  %v1111_v27 = vmul.f32 %v1109_v23, %v1055_v50 }
 0x7d1   :  { %v1061_v54 = vmul.f32 %v2423_v53, %v1058_v46  ;;  %vm1066_vm2 = vweird.f32 %v2423_v53 }
 0x7d2   :  { %2424 = vrcp.f32 %v1059_v56  ;;  %vm1067_vm4 = vmor %vm1065_vm3, %vm1066_vm2  ;;  %v1086_v10 = vand.u32 2147483648, %v1059_v56  ;;  %v1084_v17 = vand.u32 2147483647, %v1059_v56  ;;  %vm1080_vm7 = vweird.f32 %v1059_v56 }
 0x7d3   :  { %v1062_v57 = vsub.f32 1.0, %v1061_v54  ;;  %2426 = vpow2.f32 %v1112_v18  ;;  %v1114_v32 = vmul.f32 1.442695, %v1111_v27  ;;  %v2953_v18 = vld [vmem:[%s3140_s1 + $0x1c0] sm:$0xff] }
 0x7d4   :  { %v1087_v16 = vor.u32 1.1754944e-38, %v1086_v10  ;;  %vm1085_vm12 = vcmp.eq.f32.partialorder %v1084_v17, 8.507059e+37  ;;  %1272 = vmatpush.bf16.msra.mxu0 %v2953_v18 }
 0x7d5   :  { %v1063_v22 = vmul.f32 %v2423_v53, %v1062_v57  ;;  %2428 = vpow2.f32 %v1114_v32 }
 0x7d7   :  { %v1064_v61 = vadd.f32 %v2423_v53, %v1063_v22  ;;  %v1051_v22 = vmul.f32 0.5, %v2897_v47 }
 0x7d8   :  { %v2425_v0 = vpop.eup %2424 }
 0x7d9   :  { %v1068_v28 = vsel %vm1067_vm4, %v2423_v53, %v1064_v61  ;;  %v1076_v3 = vmul.f32 %v2425_v0, %v1059_v56  ;;  %vm1081_vm6 = vweird.f32 %v2425_v0  ;;  %v2427_v35 = vpop.eup %2426 }
 0x7da   :  { %v1073_v1 = vsel %vm1070_vm5, %v1072_v63, %v1068_v28  ;;  %vm1082_vm11 = vmor %vm1080_vm7, %vm1081_vm6 }
 0x7db   :  { %v1090_v5 = vmul.f32 1.0614054, %v1073_v1  ;;  %v1077_v7 = vsub.f32 1.0, %v1076_v3  ;;  %v2429_v52 = vpop.eup %2428 }
 0x7dd   :  { %v2176_v9 = vadd.f32 -1.4531521, %v1090_v5  ;;  %v1078_v33 = vmul.f32 %v2425_v0, %v1077_v7  ;;  %v2933_v5 = vld [vmem:[%s3141_s2 + $0x15] ss:$0 sm:$0xff] }
 0x7df   :  { %v1094_v11 = vmul.f32 %v2176_v9, %v1073_v1  ;;  %v1079_v14 = vadd.f32 %v2425_v0, %v1078_v33 }
 0x7e1   :  { %v1096_v15 = vadd.f32 1.4214138, %v1094_v11  ;;  %v1083_v19 = vsel %vm1082_vm11, %v2425_v0, %v1079_v14 }
 0x7e2   :  { %v1088_v13 = vsel %vm1085_vm12, %v1087_v16, %v1083_v19 }
 0x7e3   :  { %v1098_v20 = vmul.f32 %v1096_v15, %v1073_v1  ;;  %v1091_v24 = vmul.f32 1.0614054, %v1088_v13 }
 0x7e5   :  { %v2178_v8 = vadd.f32 -0.28449672, %v1098_v20  ;;  %v2177_v25 = vadd.f32 -1.4531521, %v1091_v24 }
 0x7e7   :  { %v1102_v26 = vmul.f32 %v2178_v8, %v1073_v1  ;;  %v1095_v29 = vmul.f32 %v2177_v25, %v1088_v13 }
 0x7e9   :  { %v1104_v30 = vadd.f32 0.2548296, %v1102_v26  ;;  %v1097_v31 = vadd.f32 1.4214138, %v1095_v29 }
 0x7eb   :  { %v1106_v4 = vmul.f32 %v1104_v30, %v1073_v1  ;;  %v1099_v36 = vmul.f32 %v1097_v31, %v1088_v13 }
 0x7ed   :  { %v1116_v38 = vmul.f32 %v2427_v35, %v1106_v4  ;;  %v2179_v39 = vadd.f32 -0.28449672, %v1099_v36 }
 0x7ef   :  { %v1118_v40 = vsub.f32 1.0, %v1116_v38  ;;  %v1103_v43 = vmul.f32 %v2179_v39, %v1088_v13 }
 0x7f1   :  { %v1105_v44 = vadd.f32 0.2548296, %v1103_v43  ;;  %v1122_v45 = vsub.f32 0.0, %v1118_v40 }
 0x7f3   :  { %v1107_v46 = vmul.f32 %v1105_v44, %v1088_v13  ;;  %v1124_v50 = vsel %vm1120_vm13, %v1122_v45, %v1118_v40 }
 0x7f4   :  { %v1126_v57 = vadd.f32 1.0, %v1124_v50 }
 0x7f5   :  { %v1117_v53 = vmul.f32 %v2429_v52, %v1107_v46 }
 0x7f6   :  { %v1128_v61 = vmul.f32 %v1126_v57, %v1050_v60 }
 0x7f7   :  { %v1119_v54 = vsub.f32 1.0, %v1117_v53 }
 0x7f9   :  { %v1123_v56 = vsub.f32 0.0, %v1119_v54 }
 0x7fb   :  { %v1125_v58 = vsel %vm1121_vm14, %v1123_v56, %v1119_v54  ;;  %v2963_v54 = vld [vmem:[%s3141_s2 + $0x16] ss:$0 sm:$0xff] }
 0x7fc   :  { %v1127_v21 = vadd.f32 1.0, %v1125_v58 }
 0x7fe   :  { %v1129_v62 = vmul.f32 %v1127_v21, %v1051_v22 }
 0x800   :  { %v1130_v63 = vpack.c.bf16 %v1129_v62, %v1128_v61 }
 0x802   :  { %2196 = vmatmul.msk.bf16.vlgmr.msra.gmra.mxu3 %vm1163_vm15, %v1130_v63 }
 0x885   :  { %v1176_v0 = vpop.f32.mrf.mxu3 }
 0x886   :  { %v1181_v28 = vadd.f32 %v1176_v0, %v2859_v55 }
 0x888   :  { %v2921_v1 = vadd.f32 %v1185_v51, %v1181_v28 }
 0x88a   :  { %v1190_v49 = vsel %vm522_vm0, %v2921_v1, 0.0 }
 0x88b   :  { %1191 = vadd.xlane.f32.xlu2 %v1190_v49 }
 0x88d   :  { %v1178_v41 = vpop.f32.mrf.mxu3 }
 0x88e   :  { %v1182_v47 = vadd.f32 %v1178_v41, %v2864_v59 }
 0x890   :  { %v2926_v2 = vadd.f32 %v1185_v51, %v1182_v47 }
 0x892   :  { %v1193_v3 = vsel %vm522_vm0, %v2926_v2, 0.0 }
 0x893   :  { %1194 = vadd.xlane.f32.xlu1 %v1193_v3 }
 0x8ac   :  { %1238 = vrot.lane.b32.xlu1 %v2933_v5, %s2483_s29 }
 0x8fe   :  { %v1192_v55 = vpop.xlane.xlu2 %1191 }
 0x8ff   :  { %v1196_v6 = vmul.f32 %v1192_v55, %v2725_v37 }
 0x901   :  { %v1198_v7 = vsub.f32 %v2921_v1, %v1196_v6 }
 0x903   :  { %v1200_v59 = vmul.f32 %v1198_v7, %v1198_v7 }
 0x905   :  { %v1202_v9 = vsel %vm522_vm0, %v1200_v59, 0.0 }
 0x906   :  { %1203 = vadd.xlane.f32.xlu0 %v1202_v9  ;;  %v1195_v10 = vpop.xlane.xlu1 %1194 }
 0x907   :  { %v1197_v48 = vmul.f32 %v1195_v10, %v2725_v37 }
 0x909   :  { %v1199_v33 = vsub.f32 %v2926_v2, %v1197_v48 }
 0x90b   :  { %v1201_v17 = vmul.f32 %v1199_v33, %v1199_v33 }
 0x90d   :  { %v1205_v11 = vsel %vm522_vm0, %v1201_v17, 0.0 }
 0x90e   :  { %1206 = vadd.xlane.f32.xlu2 %v1205_v11 }
 0x91e   :  { %v1239_v44 = vpop.permute.xlu1 %1238 }
 0x979   :  { %v1204_v14 = vpop.xlane.xlu0 %1203 }
 0x97a   :  { %v1208_v15 = vmul.f32 %v1204_v14, %v2725_v37 }
 0x97c   :  { %v1210_v16 = vadd.f32 1e-12, %v1208_v15 }
 0x97e   :  { %2430 = vrsqrt.f32 %v1210_v16  ;;  %vm1218_vm2 = vweird.f32 %v1210_v16 }
 0x981   :  { %v1207_v19 = vpop.xlane.xlu2 %1206 }
 0x982   :  { %v1209_v20 = vmul.f32 %v1207_v19, %v2725_v37 }
 0x984   :  { %v2431_v13 = vpop.eup %2430  ;;  %v1211_v23 = vadd.f32 1e-12, %v1209_v20 }
 0x985   :  { %v1213_v24 = vmul.f32 %v2431_v13, %v1210_v16  ;;  %vm1219_vm1 = vweird.f32 %v2431_v13 }
 0x986   :  { %2432 = vrsqrt.f32 %v1211_v23  ;;  %vm1220_vm3 = vmor %vm1218_vm2, %vm1219_vm1  ;;  %vm1228_vm5 = vweird.f32 %v1211_v23 }
 0x987   :  { %v1214_v8 = vmul.f32 %v2431_v13, %v1213_v24 }
 0x989   :  { %v1215_v25 = vmul.f32 0.5, %v1214_v8 }
 0x98b   :  { %v1216_v26 = vsub.f32 1.5, %v1215_v25 }
 0x98c   :  { %v2433_v27 = vpop.eup %2432 }
 0x98d   :  { %v1217_v29 = vmul.f32 %v2431_v13, %v1216_v26  ;;  %v1223_v30 = vmul.f32 %v2433_v27, %v1211_v23  ;;  %vm1229_vm4 = vweird.f32 %v2433_v27 }
 0x98e   :  { %vm1230_vm6 = vmor %vm1228_vm5, %vm1229_vm4 }
 0x98f   :  { %v1224_v31 = vmul.f32 %v2433_v27, %v1223_v30  ;;  %v1221_v32 = vsel %vm1220_vm3, %v2431_v13, %v1217_v29 }
 0x990   :  { %v1232_v36 = vmul.f32 %v1221_v32, %v1198_v7 }
 0x991   :  { %v1225_v4 = vmul.f32 0.5, %v1224_v31 }
 0x992   :  { %v1235_v43 = vmul.f32 %v2933_v5, %v1232_v36 }
 0x993   :  { %v1226_v35 = vsub.f32 1.5, %v1225_v4 }
 0x994   :  { %v1241_v46 = vadd.f32 %v1239_v44, %v1235_v43 }
 0x995   :  { %v1227_v38 = vmul.f32 %v2433_v27, %v1226_v35 }
 0x997   :  { %v1231_v39 = vsel %vm1230_vm6, %v2433_v27, %v1227_v38 }
 0x998   :  { %v1233_v40 = vmul.f32 %v1231_v39, %v1199_v33 }
 0x99a   :  { %v1236_v45 = vmul.f32 %v2933_v5, %v1233_v40 }
 0x99c   :  { %v1242_v52 = vadd.f32 %v1239_v44, %v1236_v45 }
 0x99e   :  { %v1243_v53 = vpack.c.bf16 %v1242_v52, %v1241_v46 }
 0x9a0   :  { %2205 = vmatmul.msk.bf16.vlgmr.msra.gmra.mxu0 %vm522_vm0, %v1243_v53 }
 0xa1d   :  { %v1274_v50 = vpop.f32.mrf.mxu0 }
 0xa1e   :  { %v1275_v57 = vadd.f32 %v2963_v54, %v1274_v50 }
 0xa25   :  { %v1276_v56 = vpop.f32.mrf.mxu0 }
 0xa26   :  { %v1277_v58 = vadd.f32 %v2963_v54, %v1276_v56 }
 0xa28   :  { %v2967_v60 = vpack.c.bf16 %v1277_v58, %v1275_v57 }
 0xa2a   :  { %1346 = vrot.lane.b32.xlu1 %v2967_v60, %s2484_s9  ;;  %1348 = vrot.lane.b32.xlu0 %v2967_v60, %s2485_s10 }
 0xa2b   :  { %1281 = vrot.lane.b32.xlu2 %v2967_v60, %s2483_s29 }
 0xa32   :  { %1413 = vrot.lane.b32.xlu1 %v2967_v60, %s2490_s15  ;;  %1482 = vrot.lane.b32.xlu0 %v2967_v60, %s2489_s14 }
 0xa33   :  { %1415 = vrot.lane.b32.xlu2 %v2967_v60, %s2488_s13 }
 0xa3b   :  { %1480 = vrot.lane.b32.xlu2 %v2967_v60, %s2486_s11 }
 0xa85   :  { %v1282_v22 = vpop.permute.xlu2 %1281 }
 0xa86   :  { %v1287_v21 = vsel %vm631_vm8, %v1282_v22, 0 }
 0xa87   :  { %1296 = vmatpush.bf16.xpose.msra.mxu1 %v1287_v21 }
 0xa8d   :  { %v1416_v61 = vpop.permute.xlu2 %1415 }
 0xa8e   :  { %v1421_v62 = vsel %vm631_vm8, %v1416_v61, 0  ;;  %2206 = vmatmul.msk.bf16.vlgmr.msra.gmra.mxu1 %vm631_vm8, %v2967_v60 }
 0xa8f   :  { %1430 = vmatpush.bf16.xpose.msrb.mxu1 %v1421_v62 }
 0xa95   :  { %v1481_v47 = vpop.permute.xlu2 %1480 }
 0xa9c   :  { %v1347_v63 = vpop.permute.xlu1 %1346  ;;  %v1349_v0 = vpop.permute.xlu0 %1348 }
 0xa9d   :  { %v1354_v51 = vsel %vm631_vm8, %v1349_v0, 0 }
 0xa9e   :  { %1363 = vmatpush.bf16.xpose.msrb.mxu3 %v1354_v51 }
 0xaa4   :  { %v1414_v28 = vpop.permute.xlu1 %1413  ;;  %v1483_v49 = vpop.permute.xlu0 %1482 }
 0xaa5   :  { %v1488_v41 = vsel %vm631_vm8, %v1483_v49, 0  ;;  %2208 = vmatmul.msk.bf16.vlgmr.msrb.gmra.mxu3 %vm631_vm8, %v1347_v63  ;;  %2210 = vmatmul.msk.bf16.vlgmr.msrb.gmra.mxu1 %vm631_vm8, %v1414_v28 }
 0xaa6   :  { %1497 = vmatpush.bf16.xpose.msra.mxu3 %v1488_v41 }
 0xab5   :  { %2212 = vmatmul.msk.bf16.vlgmr.msra.gmra.mxu3 %vm631_vm8, %v1481_v47 }
 0xb0b   :  { %v1298_v3 = vpop.f32.mrf.mxu1 }
 0xb0c   :  { %v1299_v55 = vadd.f32 %v1298_v3, %v2786_v34 }
 0xb0e   :  { %v1303_v6 = vsel %vm652_vm9, %v1299_v55, -inf }
 0xb0f   :  { %1304 = vmax.xlane.f32.xlu0 %v1303_v6 }
 0xb13   :  { %v1300_v7 = vpop.f32.mrf.mxu1 }
 0xb14   :  { %v1301_v59 = vadd.f32 %v1300_v7, %v2792_v42 }
 0xb16   :  { %v1306_v9 = vsel %vm652_vm9, %v1301_v59, -inf }
 0xb17   :  { %1307 = vmax.xlane.f32.xlu1 %v1306_v9 }
 0xb22   :  { %v1432_v10 = vpop.f32.mrf.mxu1 }
 0xb23   :  { %v1433_v48 = vadd.f32 %v1432_v10, %v2786_v34 }
 0xb25   :  { %v1437_v33 = vsel %vm652_vm9, %v1433_v48, -inf }
 0xb26   :  { %1438 = vmax.xlane.f32.xlu1 %v1437_v33 }
 0xb28   :  { %v1365_v17 = vpop.f32.mrf.mxu3 }
 0xb29   :  { %v1366_v11 = vadd.f32 %v1365_v17, %v2786_v34 }
 0xb2a   :  { %v1434_v15 = vpop.f32.mrf.mxu1 }
 0xb2b   :  { %v1370_v14 = vsel %vm652_vm9, %v1366_v11, -inf  ;;  %v1435_v16 = vadd.f32 %v1434_v15, %v2792_v42 }
 0xb2c   :  { %1371 = vmax.xlane.f32.xlu2 %v1370_v14 }
 0xb2d   :  { %v1440_v23 = vsel %vm652_vm9, %v1435_v16, -inf }
 0xb30   :  { %v1367_v19 = vpop.f32.mrf.mxu3 }
 0xb31   :  { %v1368_v20 = vadd.f32 %v1367_v19, %v2792_v42 }
 0xb33   :  { %v1373_v13 = vsel %vm652_vm9, %v1368_v20, -inf }
 0xb34   :  { %1374 = vmax.xlane.f32.xlu0 %v1373_v13  ;;  %1441 = vmax.xlane.f32.xlu2 %v1440_v23 }
 0xb38   :  { %v1499_v24 = vpop.f32.mrf.mxu3 }
 0xb39   :  { %v1500_v8 = vadd.f32 %v1499_v24, %v2786_v34 }
 0xb3b   :  { %v1504_v25 = vsel %vm652_vm9, %v1500_v8, -inf }
 0xb3c   :  { %1505 = vmax.xlane.f32.xlu0 %v1504_v25 }
 0xb40   :  { %v1501_v26 = vpop.f32.mrf.mxu3 }
 0xb41   :  { %v1502_v27 = vadd.f32 %v1501_v26, %v2792_v42 }
 0xb43   :  { %v1507_v29 = vsel %vm652_vm9, %v1502_v27, -inf }
 0xb44   :  { %1508 = vmax.xlane.f32.xlu1 %v1507_v29 }
 0xb82   :  { %v1305_v30 = vpop.xlane.xlu0 %1304 }
 0xb83   :  { %v1309_v31 = vsub.f32 %v1299_v55, %v1305_v30 }
 0xb85   :  { %v1311_v4 = vmul.f32 1.442695, %v1309_v31 }
 0xb87   :  { %2434 = vpow2.f32 %v1311_v4 }
 0xb8a   :  { %v1308_v32 = vpop.xlane.xlu1 %1307 }
 0xb8b   :  { %v1310_v35 = vsub.f32 %v1301_v59, %v1308_v32 }
 0xb8d   :  { %v3008_v36 = vpop.eup %2434  ;;  %v1313_v38 = vmul.f32 1.442695, %v1310_v35 }
 0xb8e   :  { %v1315_v34 = vsel %vm652_vm9, %v3008_v36, 0.0 }
 0xb8f   :  { %2436 = vpow2.f32 %v1313_v38  ;;  %1316 = vadd.xlane.f32.xlu2 %v1315_v34 }
 0xb95   :  { %v2437_v39 = vpop.eup %2436 }
 0xb96   :  { %v1318_v42 = vsel %vm652_vm9, %v2437_v39, 0.0 }
 0xb97   :  { %1319 = vadd.xlane.f32.xlu0 %v1318_v42 }
 0xb99   :  { %v1439_v45 = vpop.xlane.xlu1 %1438 }
 0xb9a   :  { %v1443_v50 = vsub.f32 %v1433_v48, %v1439_v45 }
 0xb9c   :  { %v1445_v58 = vmul.f32 1.442695, %v1443_v50 }
 0xb9f   :  { %v1372_v40 = vpop.xlane.xlu2 %1371 }
 0xba0   :  { %v1376_v43 = vsub.f32 %v1366_v11, %v1372_v40 }
 0xba2   :  { %v1378_v44 = vmul.f32 1.442695, %v1376_v43 }
 0xba4   :  { %2438 = vpow2.f32 %v1378_v44 }
 0xba7   :  { %v1375_v46 = vpop.xlane.xlu0 %1374  ;;  %v1442_v22 = vpop.xlane.xlu2 %1441 }
 0xba8   :  { %v1377_v52 = vsub.f32 %v1368_v20, %v1375_v46  ;;  %v1444_v61 = vsub.f32 %v1435_v16, %v1442_v22 }
 0xbaa   :  { %v2439_v53 = vpop.eup %2438  ;;  %v1380_v56 = vmul.f32 1.442695, %v1377_v52  ;;  %v1447_v63 = vmul.f32 1.442695, %v1444_v61 }
 0xbab   :  { %1326 = vrot.lane.b32.xlu0 %v2967_v60, %s2487_s12  ;;  %v1382_v57 = vsel %vm652_vm9, %v2439_v53, 0.0 }
 0xbac   :  { %2440 = vpow2.f32 %v1380_v56  ;;  %1383 = vadd.xlane.f32.xlu1 %v1382_v57 }
 0xbad   :  { %2442 = vpow2.f32 %v1445_v58 }
 0xbae   :  { %2444 = vpow2.f32 %v1447_v63 }
 0xbaf   :  { %v1506_v3 = vpop.xlane.xlu0 %1505 }
 0xbb0   :  { %v1510_v55 = vsub.f32 %v1500_v8, %v1506_v3 }
 0xbb2   :  { %v2441_v21 = vpop.eup %2440  ;;  %v1512_v7 = vmul.f32 1.442695, %v1510_v55 }
 0xbb3   :  { %v1385_v62 = vsel %vm652_vm9, %v2441_v21, 0.0  ;;  %v2443_v51 = vpop.eup %2442 }
 0xbb4   :  { %1386 = vadd.xlane.f32.xlu2 %v1385_v62  ;;  %v1449_v49 = vsel %vm652_vm9, %v2443_v51, 0.0  ;;  %v2445_v47 = vpop.eup %2444 }
 0xbb5   :  { %v1452_v6 = vsel %vm652_vm9, %v2445_v47, 0.0 }
 0xbb7   :  { %v1509_v0 = vpop.xlane.xlu1 %1508 }
 0xbb8   :  { %v1511_v28 = vsub.f32 %v1502_v27, %v1509_v0 }
 0xbba   :  { %v1514_v41 = vmul.f32 1.442695, %v1511_v28 }
 0xbbc   :  { %1450 = vadd.xlane.f32.xlu2 %v1449_v49  ;;  %2446 = vpow2.f32 %v1514_v41 }
 0xbbd   :  { %2448 = vpow2.f32 %v1512_v7 }
 0xbc2   :  { %v2447_v59 = vpop.eup %2446 }
 0xbc3   :  { %v1519_v9 = vsel %vm652_vm9, %v2447_v59, 0.0  ;;  %v2449_v10 = vpop.eup %2448 }
 0xbc4   :  { %1453 = vadd.xlane.f32.xlu2 %v1452_v6  ;;  %v1516_v48 = vsel %vm652_vm9, %v2449_v10, 0.0 }
 0xbc5   :  { %1393 = vrot.lane.b32.xlu1 %v2967_v60, %s2491_s16 }
 0xbcc   :  { %1520 = vadd.xlane.f32.xlu2 %v1519_v9 }
 0xbcd   :  { %1527 = vrot.lane.b32.xlu1 %v2967_v60, %s2493_s18 }
 0xbd5   :  { %1517 = vadd.xlane.f32.xlu0 %v1516_v48  ;;  %1580 = vrot.lane.b32.xlu1 %v2946_v12, %s2494_s19 }
 0xbe4   :  { %1460 = vrot.lane.b32.xlu2 %v2967_v60, %s2492_s17 }
 0xbe9   :  { %1578 = vrot.lane.b32.xlu0 %v2953_v18, %s2494_s19 }
 0xc02   :  { %v1317_v17 = vpop.xlane.xlu2 %1316 }
 0xc0a   :  { %v1320_v33 = vpop.xlane.xlu0 %1319 }
 0xc0b   :  { %2450 = vrcp.f32 %v1320_v33 }
 0xc0c   :  { %2452 = vrcp.f32 %v1317_v17 }
 0xc11   :  { %v2451_v11 = vpop.eup %2450 }
 0xc12   :  { %v2453_v14 = vpop.eup %2452  ;;  %v1324_v15 = vmul.f32 %v2451_v11, %v2437_v39 }
 0xc13   :  { %v1323_v16 = vmul.f32 %v2453_v14, %v3008_v36 }
 0xc15   :  { %v1325_v20 = vpack.c.bf16 %v1324_v15, %v1323_v16 }
 0xc1d   :  { %v1327_v19 = vpop.permute.xlu0 %1326 }
 0xc1e   :  { %1339 = vmatpush.bf16.msrb.mxu2 %v1327_v19 }
 0xc1f   :  { %v1384_v13 = vpop.xlane.xlu1 %1383 }
 0xc21   :  { %2207 = vmatmul.msk.bf16.vlgmr.msrb.gmra.mxu2 %vm652_vm9, %v1325_v20 }
 0xc27   :  { %v1387_v12 = vpop.xlane.xlu2 %1386 }
 0xc28   :  { %2454 = vrcp.f32 %v1387_v12 }
 0xc29   :  { %2456 = vrcp.f32 %v1384_v13 }
 0xc2e   :  { %v2455_v18 = vpop.eup %2454 }
 0xc2f   :  { %v1451_v60 = vpop.xlane.xlu2 %1450  ;;  %v2457_v23 = vpop.eup %2456  ;;  %v1391_v24 = vmul.f32 %v2455_v18, %v2441_v21 }
 0xc30   :  { %v1390_v8 = vmul.f32 %v2457_v23, %v2439_v53 }
 0xc32   :  { %v1392_v27 = vpack.c.bf16 %v1391_v24, %v1390_v8 }
 0xc37   :  { %v1394_v25 = vpop.permute.xlu1 %1393  ;;  %v1454_v26 = vpop.xlane.xlu2 %1453 }
 0xc38   :  { %1406 = vmatpush.bf16.msrb.mxu0 %v1394_v25  ;;  %2458 = vrcp.f32 %v1454_v26 }
 0xc39   :  { %2460 = vrcp.f32 %v1451_v60 }
 0xc3b   :  { %2209 = vmatmul.msk.bf16.vlgmr.msrb.gmra.mxu0 %vm652_vm9, %v1392_v27 }
 0xc3e   :  { %v2459_v31 = vpop.eup %2458 }
 0xc3f   :  { %v1528_v29 = vpop.permute.xlu1 %1527  ;;  %v1521_v30 = vpop.xlane.xlu2 %1520  ;;  %v1458_v32 = vmul.f32 %v2459_v31, %v2445_v47 }
 0xc40   :  { %1540 = vmatpush.bf16.msra.mxu0 %v1528_v29  ;;  %v2461_v4 = vpop.eup %2460  ;;  %2462 = vrcp.f32 %v1521_v30  ;;  %v2319_v29 = vld [vmem:[%s3140_s1 + $0x1d8] sm:$0xff] }
 0xc41   :  { %v1457_v35 = vmul.f32 %v2461_v4, %v2443_v51  ;;  %v2318_v4 = vld [vmem:[%s3140_s1 + $0x1d0] sm:$0xff] }
 0xc43   :  { %v1459_v34 = vpack.c.bf16 %v1458_v32, %v1457_v35  ;;  %v2377_v35 = vld [vmem:[%s3141_s2 + $0x17] ss:$0 sm:$0xff] }
 0xc46   :  { %v2463_v39 = vpop.eup %2462 }
 0xc47   :  { %v1461_v36 = vpop.permute.xlu2 %1460  ;;  %v1525_v40 = vmul.f32 %v2463_v39, %v2447_v59  ;;  %v1581_v52 = vpop.permute.xlu1 %1580 }
 0xc48   :  { %v1518_v38 = vpop.xlane.xlu0 %1517  ;;  %1473 = vmatpush.bf16.msra.mxu2 %v1461_v36  ;;  %1593 = vmatpush.bf16.msra.mxu1 %v1581_v52 }
 0xc49   :  { %2464 = vrcp.f32 %v1518_v38 }
 0xc4b   :  { %2211 = vmatmul.msk.bf16.vlgmr.msra.gmra.mxu2 %vm652_vm9, %v1459_v34 }
 0xc4c   :  { %1691 = vmatpush.bf16.msrb.mxu2 %v2319_v29 }
 0xc4f   :  { %v2465_v42 = vpop.eup %2464 }
 0xc50   :  { %v1524_v43 = vmul.f32 %v2465_v42, %v2449_v10  ;;  %1692 = vmatpush.bf16.msrb.mxu2 %v2318_v4 }
 0xc52   :  { %v1526_v44 = vpack.c.bf16 %v1525_v40, %v1524_v43 }
 0xc54   :  { %2213 = vmatmul.msk.bf16.vlgmr.msra.gmra.mxu0 %vm652_vm9, %v1526_v44 }
 0xc5b   :  { %v1579_v63 = vpop.permute.xlu0 %1578 }
 0xc5c   :  { %1594 = vmatpush.bf16.msra.mxu1 %v1579_v63 }
 0xca4   :  { %v1341_v46 = vpop.f32.mrf.mxu2 }
 0xcac   :  { %v1343_v56 = vpop.f32.mrf.mxu2 }
 0xcb8   :  { %v1408_v45 = vpop.f32.mrf.mxu0 }
 0xcc0   :  { %v1410_v53 = vpop.f32.mrf.mxu0 }
 0xcc1   :  { %v2357_v50 = vpack.i.bf16 %v1410_v53, %v1408_v45 }
 0xcc3   :  { %2358 = vrot.lane.b32.xlu1 %v2357_v50, %s2495_s20 }
 0xcce   :  { %v1475_v57 = vpop.f32.mrf.mxu2 }
 0xcd1   :  { %v1542_v58 = vpop.f32.mrf.mxu0 }
 0xcd6   :  { %v1477_v22 = vpop.f32.mrf.mxu2 }
 0xcd7   :  { %v2362_v21 = vpack.i.bf16 %v1477_v22, %v1475_v57 }
 0xcd9   :  { %v1544_v61 = vpop.f32.mrf.mxu0  ;;  %2363 = vrot.lane.b32.xlu2 %v2362_v21, %s2496_s21 }
 0xcda   :  { %v2367_v62 = vpack.i.bf16 %v1544_v61, %v1542_v58 }
 0xcdc   :  { %2368 = vrot.lane.b32.xlu1 %v2367_v62, %s2497_s22 }
 0xce1   :  { %1604 = vrot.lane.b32.xlu2 %v2963_v54, %s2494_s19 }
 0xd33   :  { %v2364_v49 = vpop.permute.xlu2 %2363 }
 0xd34   :  { %v2366_v3 = vunpack.i.h.bf16 %v2364_v49  ;;  %v2365_v55 = vunpack.i.l.bf16 %v2364_v49 }
 0xd35   :  { %v2359_v0 = vpop.permute.xlu1 %2358 }
 0xd36   :  { %v2361_v51 = vunpack.i.h.bf16 %v2359_v0  ;;  %v2360_v28 = vunpack.i.l.bf16 %v2359_v0 }
 0xd38   :  { %v1572_v41 = vsel %vm631_vm8, %v1343_v56, %v2361_v51  ;;  %v1571_v47 = vsel %vm631_vm8, %v1341_v46, %v2360_v28 }
 0xd39   :  { %v1573_v9 = vsel %vm652_vm9, %v1571_v47, %v2365_v55  ;;  %v1574_v10 = vsel %vm652_vm9, %v1572_v41, %v2366_v3 }
 0xd3b   :  { %v1605_v11 = vpop.permute.xlu2 %1604 }
 0xd4e   :  { %v2369_v6 = vpop.permute.xlu1 %2368 }
 0xd4f   :  { %v2371_v7 = vunpack.i.h.bf16 %v2369_v6  ;;  %v2370_v59 = vunpack.i.l.bf16 %v2369_v6 }
 0xd51   :  { %v1575_v54 = vsel %vm925_vm10, %v1573_v9, %v2370_v59  ;;  %v1576_v48 = vsel %vm925_vm10, %v1574_v10, %v2371_v7 }
 0xd52   :  { %v1577_v33 = vpack.c.bf16 %v1576_v48, %v1575_v54 }
 0xd54   :  { %2214 = vmatmul.msk.bf16.vlgmr.msra.gmra.mxu1 %vm522_vm0, %v1577_v33 }
 0xdd1   :  { %v1596_v17 = vpop.f32.mrf.mxu1 }
 0xdd2   :  { %v1601_v14 = vadd.f32 %v1596_v17, %v2921_v1 }
 0xdd4   :  { %v3049_v15 = vadd.f32 %v1605_v11, %v1601_v14 }
 0xdd6   :  { %v1609_v16 = vsel %vm522_vm0, %v3049_v15, 0.0 }
 0xdd7   :  { %1610 = vadd.xlane.f32.xlu1 %v1609_v16  ;;  %v2323_v16 = vld [vmem:[%s3140_s1 + $0x1f8] sm:$0xff] }
 0xdd8   :  { %1819 = vmatpush.bf16.msrb.mxu3 %v2323_v16 }
 0xdd9   :  { %v1598_v19 = vpop.f32.mrf.mxu1 }
 0xdda   :  { %v1602_v20 = vadd.f32 %v1598_v19, %v2926_v2 }
 0xddc   :  { %v3054_v12 = vadd.f32 %v1605_v11, %v1602_v20 }
 0xdde   :  { %v1612_v13 = vsel %vm522_vm0, %v3054_v12, 0.0 }
 0xddf   :  { %1613 = vadd.xlane.f32.xlu2 %v1612_v13 }
 0xdf7   :  { %1653 = vrot.lane.b32.xlu2 %v2933_v5, %s2487_s12 }
 0xe4a   :  { %v1611_v60 = vpop.xlane.xlu1 %1610 }
 0xe4b   :  { %v1615_v1 = vmul.f32 %v1611_v60, %v2725_v37 }
 0xe4d   :  { %v1617_v18 = vsub.f32 %v3049_v15, %v1615_v1  ;;  %v2322_v1 = vld [vmem:[%s3140_s1 + $0x1f0] sm:$0xff] }
 0xe4e   :  { %1820 = vmatpush.bf16.msrb.mxu3 %v2322_v1 }
 0xe4f   :  { %v1619_v23 = vmul.f32 %v1617_v18, %v1617_v18 }
 0xe51   :  { %v1621_v24 = vsel %vm522_vm0, %v1619_v23, 0.0 }
 0xe52   :  { %1622 = vadd.xlane.f32.xlu0 %v1621_v24  ;;  %v1614_v8 = vpop.xlane.xlu2 %1613 }
 0xe53   :  { %v1616_v2 = vmul.f32 %v1614_v8, %v2725_v37 }
 0xe55   :  { %v1618_v25 = vsub.f32 %v3054_v12, %v1616_v2 }
 0xe57   :  { %v1620_v26 = vmul.f32 %v1618_v25, %v1618_v25 }
 0xe59   :  { %v1624_v27 = vsel %vm522_vm0, %v1620_v26, 0.0 }
 0xe5a   :  { %1625 = vadd.xlane.f32.xlu1 %v1624_v27  ;;  %v1654_v21 = vpop.permute.xlu2 %1653  ;;  %v2321_v27 = vld [vmem:[%s3140_s1 + $0x1e8] sm:$0xff] }
 0xe5b   :  { %1821 = vmatpush.bf16.msrb.mxu3 %v2321_v27 }
 0xe66   :  { %1832 = vrot.lane.b32.xlu0 %v2377_v35, %s2487_s12 }
 0xe73   :  { %1658 = vrot.lane.b32.xlu1 %v2933_v5, %s2494_s19 }
 0xec5   :  { %v1623_v30 = vpop.xlane.xlu0 %1622 }
 0xec6   :  { %v1627_v31 = vmul.f32 %v1623_v30, %v2725_v37 }
 0xec8   :  { %v1629_v32 = vadd.f32 1e-12, %v1627_v31 }
 0xeca   :  { %2466 = vrsqrt.f32 %v1629_v32  ;;  %vm1637_vm9 = vweird.f32 %v1629_v32 }
 0xecd   :  { %v1626_v5 = vpop.xlane.xlu1 %1625 }
 0xece   :  { %v1628_v36 = vmul.f32 %v1626_v5, %v2725_v37 }
 0xed0   :  { %v2467_v38 = vpop.eup %2466  ;;  %v1630_v34 = vadd.f32 1e-12, %v1628_v36  ;;  %v2320_v36 = vld [vmem:[%s3140_s1 + $0x1e0] sm:$0xff] }
 0xed1   :  { %v1632_v39 = vmul.f32 %v2467_v38, %v1629_v32  ;;  %vm1638_vm8 = vweird.f32 %v2467_v38  ;;  %1822 = vmatpush.bf16.msrb.mxu3 %v2320_v36 }
 0xed2   :  { %2468 = vrsqrt.f32 %v1630_v34  ;;  %vm1639_vm10 = vmor %vm1637_vm9, %vm1638_vm8  ;;  %vm1647_vm11 = vweird.f32 %v1630_v34 }
 0xed3   :  { %v1633_v42 = vmul.f32 %v2467_v38, %v1632_v39 }
 0xed5   :  { %v1634_v40 = vmul.f32 0.5, %v1633_v42 }
 0xed7   :  { %v1635_v43 = vsub.f32 1.5, %v1634_v40 }
 0xed8   :  { %v2469_v44 = vpop.eup %2468 }
 0xed9   :  { %v1642_v45 = vmul.f32 %v2469_v44, %v1630_v34  ;;  %v1636_v52 = vmul.f32 %v2467_v38, %v1635_v43  ;;  %vm1648_vm7 = vweird.f32 %v2469_v44 }
 0xeda   :  { %vm1649_vm12 = vmor %vm1647_vm11, %vm1648_vm7 }
 0xedb   :  { %v1643_v46 = vmul.f32 %v2469_v44, %v1642_v45  ;;  %v1640_v56 = vsel %vm1639_vm10, %v2467_v38, %v1636_v52 }
 0xedc   :  { %v1651_v58 = vmul.f32 %v1640_v56, %v1617_v18 }
 0xedd   :  { %v1644_v53 = vmul.f32 0.5, %v1643_v46 }
 0xede   :  { %v1656_v63 = vmul.f32 %v1654_v21, %v1651_v58 }
 0xedf   :  { %v1645_v50 = vsub.f32 1.5, %v1644_v53 }
 0xee1   :  { %v1646_v57 = vmul.f32 %v2469_v44, %v1645_v50 }
 0xee3   :  { %v1650_v22 = vsel %vm1649_vm12, %v2469_v44, %v1646_v57 }
 0xee4   :  { %v1652_v61 = vmul.f32 %v1650_v22, %v1618_v25 }
 0xee5   :  { %v1659_v62 = vpop.permute.xlu1 %1658 }
 0xee6   :  { %v1657_v0 = vmul.f32 %v1654_v21, %v1652_v61  ;;  %v1661_v51 = vadd.f32 %v1659_v62, %v1656_v63 }
 0xee8   :  { %v1662_v28 = vadd.f32 %v1659_v62, %v1657_v0 }
 0xeea   :  { %v1663_v49 = vpack.c.bf16 %v1662_v28, %v1661_v51 }
 0xeec   :  { %2223 = vmatmul.msk.bf16.vlgmr.msrb.gmra.mxu2 %vm522_vm0, %v1663_v49 }
 0xf6f   :  { %v1694_v41 = vpop.f32.mrf.mxu2 }
 0xf70   :  { %v3081_v47 = vadd.f32 %v2377_v35, %v1694_v41 }
 0xf72   :  { %v3084_v3 = vmul.f32 0.70710677, %v3081_v47 }
 0xf74   :  { %v1703_v55 = vand.u32 2147483647, %v3084_v3  ;;  %vm1769_vm8 = vcmp.lt.f32.partialorder %v3084_v3, 0.0 }
 0xf76   :  { %v1705_v6 = vmul.f32 0.3275911, %v1703_v55  ;;  %v1757_v2 = vsub.f32 0.0, %v1703_v55 }
 0xf77   :  { %v1696_v7 = vpop.f32.mrf.mxu2 }
 0xf78   :  { %v1707_v59 = vadd.f32 1.0, %v1705_v6  ;;  %v3087_v9 = vadd.f32 %v2377_v35, %v1696_v7  ;;  %v1759_v4 = vmul.f32 %v1757_v2, %v1703_v55  ;;  %v2378_v2 = vld [vmem:[%s3141_s2 + $0x10] ss:$0 sm:$0xff] }
 0xf7a   :  { %2470 = vrcp.f32 %v1707_v59  ;;  %v3090_v10 = vmul.f32 0.70710677, %v3087_v9  ;;  %v1720_v19 = vand.u32 2147483648, %v1707_v59  ;;  %v1718_v13 = vand.u32 2147483647, %v1707_v59 }
 0xf7b   :  { %vm1714_vm14 = vweird.f32 %v1707_v59  ;;  %v1761_v42 = vmul.f32 1.442695, %v1759_v4  ;;  %v1700_v16 = vmul.f32 0.5, %v3087_v9 }
 0xf7c   :  { %v1704_v54 = vand.u32 2147483647, %v3090_v10  ;;  %v1721_v18 = vor.u32 1.1754944e-38, %v1720_v19  ;;  %vm1719_vm2 = vcmp.eq.f32.partialorder %v1718_v13, 8.507059e+37  ;;  %vm1770_vm9 = vcmp.lt.f32.partialorder %v3090_v10, 0.0 }
 0xf7e   :  { %v1706_v48 = vmul.f32 0.3275911, %v1704_v54  ;;  %v1758_v45 = vsub.f32 0.0, %v1704_v54 }
 0xf80   :  { %v2471_v33 = vpop.eup %2470  ;;  %v1708_v11 = vadd.f32 1.0, %v1706_v48  ;;  %v1760_v56 = vmul.f32 %v1758_v45, %v1704_v54 }
 0xf81   :  { %v1710_v17 = vmul.f32 %v2471_v33, %v1707_v59  ;;  %vm1715_vm13 = vweird.f32 %v2471_v33 }
 0xf82   :  { %2472 = vrcp.f32 %v1708_v11  ;;  %vm1716_vm1 = vmor %vm1714_vm14, %vm1715_vm13  ;;  %v1735_v31 = vand.u32 2147483648, %v1708_v11  ;;  %v1733_v35 = vand.u32 2147483647, %v1708_v11  ;;  %vm1729_vm4 = vweird.f32 %v1708_v11 }
 0xf83   :  { %v1711_v14 = vsub.f32 1.0, %v1710_v17  ;;  %2474 = vpow2.f32 %v1761_v42  ;;  %v1763_v61 = vmul.f32 1.442695, %v1760_v56 }
 0xf84   :  { %v1736_v39 = vor.u32 1.1754944e-38, %v1735_v31  ;;  %vm1734_vm6 = vcmp.eq.f32.partialorder %v1733_v35, 8.507059e+37  ;;  %v2325_v35 = vld [vmem:[%s3140_s1 + $0x208] sm:$0xff] }
 0xf85   :  { %v1712_v20 = vmul.f32 %v2471_v33, %v1711_v14  ;;  %2476 = vpow2.f32 %v1763_v61  ;;  %v1699_v14 = vmul.f32 0.5, %v3081_v47  ;;  %1919 = vmatpush.bf16.msrb.mxu0 %v2325_v35 }
 0xf87   :  { %v1713_v60 = vadd.f32 %v2471_v33, %v1712_v20 }
 0xf88   :  { %v2473_v23 = vpop.eup %2472 }
 0xf89   :  { %v1717_v24 = vsel %vm1716_vm1, %v2471_v33, %v1713_v60  ;;  %v1725_v25 = vmul.f32 %v2473_v23, %v1708_v11  ;;  %vm1730_vm3 = vweird.f32 %v2473_v23  ;;  %v2475_v62 = vpop.eup %2474 }
 0xf8a   :  { %v1722_v8 = vsel %vm1719_vm2, %v1721_v18, %v1717_v24  ;;  %vm1731_vm5 = vmor %vm1729_vm4, %vm1730_vm3  ;;  %v1833_v18 = vpop.permute.xlu0 %1832 }
 0xf8b   :  { %v1739_v26 = vmul.f32 1.0614054, %v1722_v8  ;;  %v1726_v29 = vsub.f32 1.0, %v1725_v25  ;;  %v2477_v7 = vpop.eup %2476 }
 0xf8d   :  { %v2224_v30 = vadd.f32 -1.4531521, %v1739_v26  ;;  %v1727_v32 = vmul.f32 %v2473_v23, %v1726_v29 }
 0xf8f   :  { %v1743_v5 = vmul.f32 %v2224_v30, %v1722_v8  ;;  %v1728_v38 = vadd.f32 %v2473_v23, %v1727_v32 }
 0xf91   :  { %v1745_v34 = vadd.f32 1.4214138, %v1743_v5  ;;  %v1732_v40 = vsel %vm1731_vm5, %v2473_v23, %v1728_v38 }
 0xf92   :  { %v1737_v44 = vsel %vm1734_vm6, %v1736_v39, %v1732_v40 }
 0xf93   :  { %v1747_v43 = vmul.f32 %v1745_v34, %v1722_v8  ;;  %v1740_v46 = vmul.f32 1.0614054, %v1737_v44  ;;  %v2324_v34 = vld [vmem:[%s3140_s1 + $0x200] sm:$0xff] }
 0xf94   :  { %1920 = vmatpush.bf16.msrb.mxu0 %v2324_v34 }
 0xf95   :  { %v2226_v52 = vadd.f32 -0.28449672, %v1747_v43  ;;  %v2225_v53 = vadd.f32 -1.4531521, %v1740_v46 }
 0xf97   :  { %v1751_v50 = vmul.f32 %v2226_v52, %v1722_v8  ;;  %v1744_v57 = vmul.f32 %v2225_v53, %v1737_v44 }
 0xf99   :  { %v1753_v58 = vadd.f32 0.2548296, %v1751_v50  ;;  %v1746_v22 = vadd.f32 1.4214138, %v1744_v57 }
 0xf9b   :  { %v1755_v21 = vmul.f32 %v1753_v58, %v1722_v8  ;;  %v1748_v63 = vmul.f32 %v1746_v22, %v1737_v44 }
 0xf9d   :  { %v1765_v0 = vmul.f32 %v2475_v62, %v1755_v21  ;;  %v2227_v51 = vadd.f32 -0.28449672, %v1748_v63 }
 0xf9f   :  { %v1767_v28 = vsub.f32 1.0, %v1765_v0  ;;  %v1752_v49 = vmul.f32 %v2227_v51, %v1737_v44 }
 0xfa1   :  { %v1754_v41 = vadd.f32 0.2548296, %v1752_v49  ;;  %v1771_v55 = vsub.f32 0.0, %v1767_v28 }
 0xfa3   :  { %v1756_v6 = vmul.f32 %v1754_v41, %v1737_v44  ;;  %v1773_v54 = vsel %vm1769_vm8, %v1771_v55, %v1767_v28 }
 0xfa4   :  { %v1775_v17 = vadd.f32 1.0, %v1773_v54 }
 0xfa5   :  { %v1766_v59 = vmul.f32 %v2477_v7, %v1756_v6  ;;  %v2379_v6 = vld [vmem:[%s3141_s2 + $0x11] ss:$0 sm:$0xff] }
 0xfa6   :  { %v1777_v20 = vmul.f32 %v1775_v17, %v1699_v14 }
 0xfa7   :  { %v1768_v48 = vsub.f32 1.0, %v1766_v59 }
 0xfa9   :  { %v1772_v33 = vsub.f32 0.0, %v1768_v48 }
 0xfab   :  { %v1774_v11 = vsel %vm1770_vm9, %v1772_v33, %v1768_v48 }
 0xfac   :  { %v1776_v19 = vadd.f32 1.0, %v1774_v11 }
 0xfae   :  { %v1778_v13 = vmul.f32 %v1776_v19, %v1700_v16 }
 0xfb0   :  { %v1779_v60 = vpack.c.bf16 %v1778_v13, %v1777_v20 }
 0xfb2   :  { %2244 = vmatmul.msk.bf16.vlgmr.msrb.gmra.mxu3 %vm1163_vm15, %v1779_v60 }
0x1035   :  { %v1824_v1 = vpop.f32.mrf.mxu3 }
0x1036   :  { %v1829_v3 = vadd.f32 %v1824_v1, %v3049_v15 }
0x1038   :  { %v1835_v23 = vadd.f32 %v1833_v18, %v1829_v3 }
0x103a   :  { %v1838_v24 = vsel %vm522_vm0, %v1835_v23, 0.0 }
0x103b   :  { %1839 = vadd.xlane.f32.xlu2 %v1838_v24 }
0x103d   :  { %v1826_v10 = vpop.f32.mrf.mxu3 }
0x103e   :  { %v1830_v8 = vadd.f32 %v1826_v10, %v3054_v12 }
0x1040   :  { %v1836_v47 = vadd.f32 %v1833_v18, %v1830_v8 }
0x1042   :  { %v1841_v9 = vsel %vm522_vm0, %v1836_v47, 0.0 }
0x1043   :  { %1842 = vadd.xlane.f32.xlu1 %v1841_v9 }
0x105c   :  { %1886 = vrot.lane.b32.xlu1 %v2378_v2, %s2483_s29 }
0x10ae   :  { %v1840_v25 = vpop.xlane.xlu2 %1839 }
0x10af   :  { %v1844_v15 = vmul.f32 %v1840_v25, %v2725_v37 }
0x10b1   :  { %v1846_v26 = vsub.f32 %v1835_v23, %v1844_v15 }
0x10b3   :  { %v1848_v27 = vmul.f32 %v1846_v26, %v1846_v26 }
0x10b5   :  { %v1850_v29 = vsel %vm522_vm0, %v1848_v27, 0.0 }
0x10b6   :  { %1851 = vadd.xlane.f32.xlu0 %v1850_v29  ;;  %v1843_v30 = vpop.xlane.xlu1 %1842 }
0x10b7   :  { %v1845_v12 = vmul.f32 %v1843_v30, %v2725_v37 }
0x10b9   :  { %v1847_v31 = vsub.f32 %v1836_v47, %v1845_v12 }
0x10bb   :  { %v1849_v4 = vmul.f32 %v1847_v31, %v1847_v31 }
0x10bd   :  { %v1853_v32 = vsel %vm522_vm0, %v1849_v4, 0.0 }
0x10be   :  { %1854 = vadd.xlane.f32.xlu2 %v1853_v32 }
0x10ce   :  { %v1887_v51 = vpop.permute.xlu1 %1886 }
0x1129   :  { %v1852_v5 = vpop.xlane.xlu0 %1851 }
0x112a   :  { %v1856_v36 = vmul.f32 %v1852_v5, %v2725_v37 }
0x112c   :  { %v1858_v38 = vadd.f32 1e-12, %v1856_v36 }
0x112e   :  { %2478 = vrsqrt.f32 %v1858_v38  ;;  %vm1866_vm10 = vweird.f32 %v1858_v38 }
0x1131   :  { %v1855_v39 = vpop.xlane.xlu2 %1854 }
0x1132   :  { %v1857_v42 = vmul.f32 %v1855_v39, %v2725_v37 }
0x1134   :  { %v2479_v40 = vpop.eup %2478  ;;  %v1859_v43 = vadd.f32 1e-12, %v1857_v42 }
0x1135   :  { %v1861_v44 = vmul.f32 %v2479_v40, %v1858_v38  ;;  %vm1867_vm15 = vweird.f32 %v2479_v40 }
0x1136   :  { %2480 = vrsqrt.f32 %v1859_v43  ;;  %vm1868_vm7 = vmor %vm1866_vm10, %vm1867_vm15  ;;  %vm1876_vm12 = vweird.f32 %v1859_v43 }
0x1137   :  { %v1862_v45 = vmul.f32 %v2479_v40, %v1861_v44 }
0x1139   :  { %v1863_v46 = vmul.f32 0.5, %v1862_v45 }
0x113b   :  { %v1864_v52 = vsub.f32 1.5, %v1863_v46 }
0x113c   :  { %v2481_v53 = vpop.eup %2480 }
0x113d   :  { %v1871_v50 = vmul.f32 %v2481_v53, %v1859_v43  ;;  %v1865_v56 = vmul.f32 %v2479_v40, %v1864_v52  ;;  %vm1877_vm11 = vweird.f32 %v2481_v53 }
0x113e   :  { %vm1878_vm13 = vmor %vm1876_vm12, %vm1877_vm11 }
0x113f   :  { %v1872_v57 = vmul.f32 %v2481_v53, %v1871_v50  ;;  %v1869_v22 = vsel %vm1868_vm7, %v2479_v40, %v1865_v56 }
0x1140   :  { %v1880_v61 = vmul.f32 %v1869_v22, %v1846_v26 }
0x1141   :  { %v1873_v58 = vmul.f32 0.5, %v1872_v57 }
0x1142   :  { %v1883_v0 = vmul.f32 %v2378_v2, %v1880_v61 }
0x1143   :  { %v1874_v21 = vsub.f32 1.5, %v1873_v58 }
0x1144   :  { %v1889_v49 = vadd.f32 %v1887_v51, %v1883_v0 }
0x1145   :  { %v1875_v37 = vmul.f32 %v2481_v53, %v1874_v21 }
0x1147   :  { %v1879_v62 = vsel %vm1878_vm13, %v2481_v53, %v1875_v37 }
0x1148   :  { %v1881_v63 = vmul.f32 %v1879_v62, %v1847_v31 }
0x114a   :  { %v1884_v28 = vmul.f32 %v2378_v2, %v1881_v63 }
0x114c   :  { %v1890_v41 = vadd.f32 %v1887_v51, %v1884_v28 }
0x114e   :  { %v1891_v55 = vpack.c.bf16 %v1890_v41, %v1889_v49 }
0x1150   :  { %2253 = vmatmul.msk.bf16.vlgmr.msrb.gmra.mxu0 %vm522_vm0, %v1891_v55 }
0x11cd   :  { %v1922_v7 = vpop.f32.mrf.mxu0 }
0x11ce   :  { %v1923_v59 = vadd.f32 %v2379_v6, %v1922_v7 }
0x11d0   :  { %1927 = vst [vmem:[%s3143_s3] sm:$0xff] %v1923_v59 }
0x11d5   :  { %v1924_v54 = vpop.f32.mrf.mxu0 }
0x11d6   :  { %v1925_v48 = vadd.f32 %v2379_v6, %v1924_v54 }
0x11d8   :  { %1928 = vst [vmem:[%s3143_s3 + $0x8] sm:$0xff] %v1925_v48 }

</bundles_post_ra>
